<compile_context>
chip_gen: v5e
topology: v5e:2x2
jax: 0.10.0
libtpu: 0.0.40
codegen_flags: <defaults>
</compile_context>

<pallas_src>
import functools
import math

import jax
import jax.numpy as jnp
from jax.experimental import pallas as pl


# ----------------------------------------------------------------------------
# Fused forward kernel (no grid; everything VMEM resident)
# ----------------------------------------------------------------------------
def _fused_forward_kernel(x_ref, pe_ref, mask_ref, w_in_ref, b_in_ref,
                          wqkv_ref, bqkv_ref, wo_ref, vec_ref,
                          w1_ref, b1_ref, w2_ref,
                          w_out_ref, b_out_ref, o_ref,
                          *, B, S, D, nhead, num_layers, eps):
    hd = D // nhead
    att_scale = 1.0 / math.sqrt(hd)
    R = B * S

    # ---- input projection (+pos encoding); sqrt(d_model) folded into w/b ---
    x = jnp.dot(x_ref[...], w_in_ref[...], preferred_element_type=jnp.float32)
    x = x + b_in_ref[...]
    x = x + jnp.concatenate([pe_ref[...]] * B, axis=0)          # (R, D)

    mask = mask_ref[...]                                        # (R, R) additive

    # ---- encoder layers (statically unrolled) -------------------------------
    for l in range(num_layers):
        vec = vec_ref[l]                                        # (8, D) packed
        bo, g1, bt1 = vec[0:1], vec[1:2], vec[2:3]
        b2, g2, bt2 = vec[3:4], vec[4:5], vec[5:6]

        # one QKV projection for all heads
        qkv = (jnp.dot(x, wqkv_ref[l], preferred_element_type=jnp.float32)
               + bqkv_ref[l])                                   # (R, 3D)

        # head-major stacks: heads are the single batch dim of the attention
        # matmuls; both batch elements share the rows, the block-diagonal
        # additive mask keeps them from attending across the batch.
        q_all = jnp.stack([qkv[:, h * hd:(h + 1) * hd]
                           for h in range(nhead)], axis=0)       # (H, R, hd)
        k_all = jnp.stack([qkv[:, D + h * hd:D + (h + 1) * hd]
                           for h in range(nhead)], axis=0)
        v_all = jnp.stack([qkv[:, 2 * D + h * hd:2 * D + (h + 1) * hd]
                           for h in range(nhead)], axis=0)

        s = jnp.einsum('hqd,hkd->hqk', q_all, k_all,
                       preferred_element_type=jnp.float32) * att_scale
        s = s + mask                                            # (H, R, R)
        s = s - jnp.max(s, axis=-1, keepdims=True)
        p = jnp.exp(s)
        p = p * pl.reciprocal(jnp.sum(p, axis=-1, keepdims=True), approx=True)
        ctx = jnp.einsum('hqk,hkd->hqd', p, v_all,
                         preferred_element_type=jnp.float32)    # (H, R, hd)

        # concat heads along lanes -> single out-projection matmul
        ctx_cat = jnp.concatenate([ctx[h] for h in range(nhead)], axis=-1)
        attn = jnp.dot(ctx_cat, wo_ref[l],
                       preferred_element_type=jnp.float32) + bo  # (R, D)

        # residual + LayerNorm 1 (independent sum / sum-of-squares reductions)
        h1 = x + attn
        mu1 = jnp.mean(h1, axis=-1, keepdims=True)
        ex1 = jnp.mean(h1 * h1, axis=-1, keepdims=True)
        h1 = (h1 - mu1) * jax.lax.rsqrt(ex1 - mu1 * mu1 + eps) * g1 + bt1

        # feed-forward (ReLU)
        f = jnp.dot(h1, w1_ref[l], preferred_element_type=jnp.float32) + b1_ref[l]
        f = jnp.maximum(f, 0.0)
        f = jnp.dot(f, w2_ref[l], preferred_element_type=jnp.float32) + b2

        # residual + LayerNorm 2
        h2 = h1 + f
        mu2 = jnp.mean(h2, axis=-1, keepdims=True)
        ex2 = jnp.mean(h2 * h2, axis=-1, keepdims=True)
        x = (h2 - mu2) * jax.lax.rsqrt(ex2 - mu2 * mu2 + eps) * g2 + bt2

    # ---- output head: one (B, S*D) @ (S*D, Npad) matmul ---------------------
    # Assemble (B, S*D) with static row slices + lane concats (no relayout).
    rows = []
    for b in range(B):
        rows.append(jnp.concatenate(
            [x[b * S + t: b * S + t + 1, :] for t in range(S)], axis=1))
    x_flat = jnp.concatenate(rows, axis=0)                       # (B, S*D)
    o_ref[...] = (jnp.dot(x_flat, w_out_ref[...],
                          preferred_element_type=jnp.float32) + b_out_ref[...])


# ----------------------------------------------------------------------------
# Positional encoding (wrapper-side constant; folded under jit)
# ----------------------------------------------------------------------------
def positional_encoding(seq_len, d_model):
    position = jnp.arange(seq_len, dtype=jnp.float32)[:, None]
    div_term = jnp.exp(jnp.arange(0, d_model, 2, dtype=jnp.float32)
                       * (-math.log(10000.0) / d_model))
    pe = jnp.zeros((seq_len, d_model), jnp.float32)
    pe = pe.at[:, 0::2].set(jnp.sin(position * div_term))
    pe = pe.at[:, 1::2].set(jnp.cos(position * div_term))
    return pe


# ----------------------------------------------------------------------------
# Parameter init (deterministic; mirrors the PyTorch module's shapes,
# weights stored transposed for right-multiply and stacked across layers)
# ----------------------------------------------------------------------------
def init_params(key, cfg):
    D = cfg["d_model"]
    d4 = D // 4
    comb = cfg["input_features"] - 1 + d4
    F = cfg["dim_feedforward"]
    L = cfg["num_encoder_layers"]
    S = cfg["seq_length"]
    N = cfg["pred_length"] * cfg["output_features"]
    Npad = ((N + 127) // 128) * 128

    keys = jax.random.split(key, 3 + L)
    u = lambda k, shp, a: jax.random.uniform(k, shp, jnp.float32, -a, a)

    wqkv, bqkv, wo, vec, w1, b1, w2 = [], [], [], [], [], [], []
    for i in range(L):
        lk = jax.random.split(keys[3 + i], 6)
        wq_ = u(lk[0], (D, D), 0.05)
        wk_ = u(lk[1], (D, D), 0.05)
        wv_ = u(lk[2], (D, D), 0.05)
        wqkv.append(jnp.concatenate([wq_, wk_, wv_], axis=1))     # (D, 3D)
        bqkv.append(jnp.zeros((1, 3 * D), jnp.float32))
        wo.append(u(lk[3], (D, D), 0.05))
        v = jnp.zeros((8, D), jnp.float32)                        # packed vectors
        v = v.at[1].set(1.0)                                      # g1 (LN1 gamma)
        v = v.at[4].set(1.0)                                      # g2 (LN2 gamma)
        vec.append(v)            # rows: 0=bo 1=g1 2=bt1 3=b2 4=g2 5=bt2, 6-7 pad
        w1.append(u(lk[4], (D, F), 0.05))
        b1.append(jnp.zeros((1, F), jnp.float32))
        w2.append(u(lk[5], (F, D), 0.05))

    scale = math.sqrt(D)                      # fold src_proj * sqrt(d_model)
    w_out = jnp.pad(u(keys[2], (S * D, N), 0.1), ((0, 0), (0, Npad - N)))
    b_out = jnp.zeros((1, Npad), jnp.float32)

    return {
        "emb": u(keys[0], (cfg["num_activities"], d4), 0.1),
        "w_in": u(keys[1], (comb, D), 0.1) * scale,
        "b_in": jnp.zeros((1, D), jnp.float32) * scale,
        "wqkv": jnp.stack(wqkv), "bqkv": jnp.stack(bqkv),
        "wo": jnp.stack(wo), "vec": jnp.stack(vec),
        "w1": jnp.stack(w1), "b1": jnp.stack(b1), "w2": jnp.stack(w2),
        "w_out": w_out, "b_out": b_out,
    }


# ----------------------------------------------------------------------------
# Full forward pass (one fused pallas_call)
# ----------------------------------------------------------------------------
def transformer_forecaster_forward(src, params, cfg):
    B, S, _ = src.shape
    D = cfg["d_model"]
    N = cfg["pred_length"] * cfg["output_features"]
    Npad = params["b_out"].shape[-1]

    codes = src[:, :, 0].astype(jnp.int32)               # activity ids (XLA gather)
    numerical = src[:, :, 1:]                             # (B, S, input_features-1)
    activity_embed = params["emb"][codes]                 # (B, S, d_model//4)
    combined = jnp.concatenate([activity_embed, numerical], axis=-1)
    x2d = combined.reshape(B * S, -1)                     # (B*S, comb)

    pe = positional_encoding(S, D)                        # (S, D)

    # additive block-diagonal mask: 0 within the same batch element,
    # -1e30 across batch elements (constant-folded under jit).
    row_b = jnp.arange(B * S, dtype=jnp.int32) // S
    attn_mask = jnp.where(row_b[:, None] == row_b[None, :],
                          0.0, -1e30).astype(jnp.float32)  # (B*S, B*S)

    kernel = functools.partial(
        _fused_forward_kernel, B=B, S=S, D=D, nhead=cfg["nhead"],
        num_layers=cfg["num_encoder_layers"], eps=1e-5)

    out_pad = pl.pallas_call(
        kernel,
        out_shape=jax.ShapeDtypeStruct((B, Npad), jnp.float32),
    )(x2d, pe, attn_mask, params["w_in"], params["b_in"],
      params["wqkv"], params["bqkv"], params["wo"], params["vec"],
      params["w1"], params["b1"], params["w2"],
      params["w_out"], params["b_out"])

    return out_pad[:, :N].reshape(B, cfg["pred_length"], cfg["output_features"])


# ----------------------------------------------------------------------------
if __name__ == "__main__":
    cfg = dict(
        input_features=5,        # 1 activity code + 4 numerical
        num_activities=10,
        d_model=32,
        nhead=4,
        num_encoder_layers=2,
        dim_feedforward=64,
        dropout=0.1,             # identity at inference
        output_features=3,
        seq_length=8,
        pred_length=4,
    )
    B = 2

    key = jax.random.PRNGKey(0)
    k_params, k_codes, k_num = jax.random.split(key, 3)

    params = init_params(k_params, cfg)

    codes = jax.random.randint(k_codes, (B, cfg["seq_length"], 1),
                               0, cfg["num_activities"]).astype(jnp.float32)
    numerical = jax.random.normal(k_num, (B, cfg["seq_length"],
                                          cfg["input_features"] - 1), jnp.float32)
    src = jnp.concatenate([codes, numerical], axis=-1)    # (B, S, input_features)

    @jax.jit
    def fwd(src_, params_):
        return transformer_forecaster_forward(src_, params_, cfg)

    out = jax.block_until_ready(fwd(src, params))
    assert out.shape == (B, cfg["pred_length"], cfg["output_features"])
    print("KERNEL_OK")
</pallas_src>

<mosaic_0001>
module attributes {stable_mosaic.version = 11 : i64} {
  func.func @_fused_forward_kernel(%arg0: memref<16x12xf32, #tpu.memory_space<vmem>>, %arg1: memref<8x32xf32, #tpu.memory_space<vmem>>, %arg2: memref<16x16xf32, #tpu.memory_space<vmem>>, %arg3: memref<12x32xf32, #tpu.memory_space<vmem>>, %arg4: memref<1x32xf32, #tpu.memory_space<vmem>>, %arg5: memref<2x32x96xf32, #tpu.memory_space<vmem>>, %arg6: memref<2x1x96xf32, #tpu.memory_space<vmem>>, %arg7: memref<2x32x32xf32, #tpu.memory_space<vmem>>, %arg8: memref<2x8x32xf32, #tpu.memory_space<vmem>>, %arg9: memref<2x32x64xf32, #tpu.memory_space<vmem>>, %arg10: memref<2x1x64xf32, #tpu.memory_space<vmem>>, %arg11: memref<2x64x32xf32, #tpu.memory_space<vmem>>, %arg12: memref<256x128xf32, #tpu.memory_space<vmem>>, %arg13: memref<1x128xf32, #tpu.memory_space<vmem>>, %arg14: memref<2x128xf32, #tpu.memory_space<vmem>>) attributes {dimension_semantics = [], scalar_prefetch = 0 : i64, scratch_operands = 0 : i64, tpu.core_type = #tpu.core_type<tc>} {
    %c0 = arith.constant 0 : index
    %c0_0 = arith.constant 0 : index
    %0 = vector.load %arg0[%c0, %c0_0] : memref<16x12xf32, #tpu.memory_space<vmem>>, vector<16x12xf32>
    %c0_1 = arith.constant 0 : index
    %c0_2 = arith.constant 0 : index
    %1 = vector.load %arg3[%c0_1, %c0_2] : memref<12x32xf32, #tpu.memory_space<vmem>>, vector<12x32xf32>
    %cst = arith.constant dense<0.000000e+00> : vector<16x32xf32>
    %2 = tpu.matmul %0, %1, %cst {dimension_numbers = #tpu.dot_dimension_numbers<[1], [0], [0], [1], [0, 0, 1, 1], [], []>} : vector<16x12xf32>, vector<12x32xf32>, vector<16x32xf32> -> vector<16x32xf32>
    %c0_3 = arith.constant 0 : index
    %c0_4 = arith.constant 0 : index
    %3 = vector.load %arg4[%c0_3, %c0_4] : memref<1x32xf32, #tpu.memory_space<vmem>>, vector<1x32xf32>
    %4 = vector.broadcast %3 : vector<1x32xf32> to vector<16x32xf32>
    %5 = arith.addf %2, %4 : vector<16x32xf32>
    %c0_5 = arith.constant 0 : index
    %c0_6 = arith.constant 0 : index
    %6 = vector.load %arg1[%c0_5, %c0_6] : memref<8x32xf32, #tpu.memory_space<vmem>>, vector<8x32xf32>
    %7 = tpu.concatenate %6, %6 in 0 : vector<8x32xf32>, vector<8x32xf32> -> vector<16x32xf32>
    %8 = arith.addf %5, %7 : vector<16x32xf32>
    %c0_7 = arith.constant 0 : index
    %c0_8 = arith.constant 0 : index
    %9 = vector.load %arg2[%c0_7, %c0_8] : memref<16x16xf32, #tpu.memory_space<vmem>>, vector<16x16xf32>
    %c0_9 = arith.constant 0 : index
    %c0_10 = arith.constant 0 : index
    %c0_11 = arith.constant 0 : index
    %10 = vector.load %arg8[%c0_9, %c0_10, %c0_11] : memref<2x8x32xf32, #tpu.memory_space<vmem>>, vector<1x8x32xf32>
    %11 = vector.shape_cast %10 : vector<1x8x32xf32> to vector<8x32xf32>
    %12 = vector.extract_strided_slice %11 {offsets = [0, 0], sizes = [1, 32], strides = [1, 1]} : vector<8x32xf32> to vector<1x32xf32>
    %13 = vector.extract_strided_slice %11 {offsets = [1, 0], sizes = [1, 32], strides = [1, 1]} : vector<8x32xf32> to vector<1x32xf32>
    %14 = vector.extract_strided_slice %11 {offsets = [2, 0], sizes = [1, 32], strides = [1, 1]} : vector<8x32xf32> to vector<1x32xf32>
    %15 = vector.extract_strided_slice %11 {offsets = [3, 0], sizes = [1, 32], strides = [1, 1]} : vector<8x32xf32> to vector<1x32xf32>
    %16 = vector.extract_strided_slice %11 {offsets = [4, 0], sizes = [1, 32], strides = [1, 1]} : vector<8x32xf32> to vector<1x32xf32>
    %17 = vector.extract_strided_slice %11 {offsets = [5, 0], sizes = [1, 32], strides = [1, 1]} : vector<8x32xf32> to vector<1x32xf32>
    %c0_12 = arith.constant 0 : index
    %c0_13 = arith.constant 0 : index
    %c0_14 = arith.constant 0 : index
    %18 = vector.load %arg5[%c0_12, %c0_13, %c0_14] : memref<2x32x96xf32, #tpu.memory_space<vmem>>, vector<1x32x96xf32>
    %19 = vector.shape_cast %18 : vector<1x32x96xf32> to vector<32x96xf32>
    %cst_15 = arith.constant dense<0.000000e+00> : vector<16x96xf32>
    %20 = tpu.matmul %8, %19, %cst_15 {dimension_numbers = #tpu.dot_dimension_numbers<[1], [0], [0], [1], [0, 0, 1, 1], [], []>} : vector<16x32xf32>, vector<32x96xf32>, vector<16x96xf32> -> vector<16x96xf32>
    %c0_16 = arith.constant 0 : index
    %c0_17 = arith.constant 0 : index
    %c0_18 = arith.constant 0 : index
    %21 = vector.load %arg6[%c0_16, %c0_17, %c0_18] : memref<2x1x96xf32, #tpu.memory_space<vmem>>, vector<1x1x96xf32>
    %22 = vector.shape_cast %21 : vector<1x1x96xf32> to vector<1x96xf32>
    %23 = vector.broadcast %22 : vector<1x96xf32> to vector<16x96xf32>
    %24 = arith.addf %20, %23 : vector<16x96xf32>
    %25 = vector.extract_strided_slice %24 {offsets = [0, 0], sizes = [16, 8], strides = [1, 1]} : vector<16x96xf32> to vector<16x8xf32>
    %26 = vector.extract_strided_slice %24 {offsets = [0, 8], sizes = [16, 8], strides = [1, 1]} : vector<16x96xf32> to vector<16x8xf32>
    %27 = vector.extract_strided_slice %24 {offsets = [0, 16], sizes = [16, 8], strides = [1, 1]} : vector<16x96xf32> to vector<16x8xf32>
    %28 = vector.extract_strided_slice %24 {offsets = [0, 24], sizes = [16, 8], strides = [1, 1]} : vector<16x96xf32> to vector<16x8xf32>
    %29 = vector.shape_cast %25 : vector<16x8xf32> to vector<1x16x8xf32>
    %30 = vector.shape_cast %26 : vector<16x8xf32> to vector<1x16x8xf32>
    %31 = vector.shape_cast %27 : vector<16x8xf32> to vector<1x16x8xf32>
    %32 = vector.shape_cast %28 : vector<16x8xf32> to vector<1x16x8xf32>
    %33 = tpu.concatenate %29, %30, %31, %32 in 0 : vector<1x16x8xf32>, vector<1x16x8xf32>, vector<1x16x8xf32>, vector<1x16x8xf32> -> vector<4x16x8xf32>
    %34 = vector.extract_strided_slice %24 {offsets = [0, 32], sizes = [16, 8], strides = [1, 1]} : vector<16x96xf32> to vector<16x8xf32>
    %35 = vector.extract_strided_slice %24 {offsets = [0, 40], sizes = [16, 8], strides = [1, 1]} : vector<16x96xf32> to vector<16x8xf32>
    %36 = vector.extract_strided_slice %24 {offsets = [0, 48], sizes = [16, 8], strides = [1, 1]} : vector<16x96xf32> to vector<16x8xf32>
    %37 = vector.extract_strided_slice %24 {offsets = [0, 56], sizes = [16, 8], strides = [1, 1]} : vector<16x96xf32> to vector<16x8xf32>
    %38 = vector.shape_cast %34 : vector<16x8xf32> to vector<1x16x8xf32>
    %39 = vector.shape_cast %35 : vector<16x8xf32> to vector<1x16x8xf32>
    %40 = vector.shape_cast %36 : vector<16x8xf32> to vector<1x16x8xf32>
    %41 = vector.shape_cast %37 : vector<16x8xf32> to vector<1x16x8xf32>
    %42 = tpu.concatenate %38, %39, %40, %41 in 0 : vector<1x16x8xf32>, vector<1x16x8xf32>, vector<1x16x8xf32>, vector<1x16x8xf32> -> vector<4x16x8xf32>
    %43 = vector.extract_strided_slice %24 {offsets = [0, 64], sizes = [16, 8], strides = [1, 1]} : vector<16x96xf32> to vector<16x8xf32>
    %44 = vector.extract_strided_slice %24 {offsets = [0, 72], sizes = [16, 8], strides = [1, 1]} : vector<16x96xf32> to vector<16x8xf32>
    %45 = vector.extract_strided_slice %24 {offsets = [0, 80], sizes = [16, 8], strides = [1, 1]} : vector<16x96xf32> to vector<16x8xf32>
    %46 = vector.extract_strided_slice %24 {offsets = [0, 88], sizes = [16, 8], strides = [1, 1]} : vector<16x96xf32> to vector<16x8xf32>
    %47 = vector.shape_cast %43 : vector<16x8xf32> to vector<1x16x8xf32>
    %48 = vector.shape_cast %44 : vector<16x8xf32> to vector<1x16x8xf32>
    %49 = vector.shape_cast %45 : vector<16x8xf32> to vector<1x16x8xf32>
    %50 = vector.shape_cast %46 : vector<16x8xf32> to vector<1x16x8xf32>
    %51 = tpu.concatenate %47, %48, %49, %50 in 0 : vector<1x16x8xf32>, vector<1x16x8xf32>, vector<1x16x8xf32>, vector<1x16x8xf32> -> vector<4x16x8xf32>
    "tpu.trace_start"() <{level = 10 : i32, message = "hqd,hkd->hqk"}> : () -> ()
    %cst_19 = arith.constant dense<0.000000e+00> : vector<4x16x16xf32>
    %52 = tpu.matmul %33, %42, %cst_19 {dimension_numbers = #tpu.dot_dimension_numbers<[2], [2], [1], [1], [0, 0, 0, 1, 1, 1], [0], [0]>} : vector<4x16x8xf32>, vector<4x16x8xf32>, vector<4x16x16xf32> -> vector<4x16x16xf32>
    "tpu.trace_stop"() : () -> ()
    %cst_20 = arith.constant 0.353553385 : f32
    %53 = vector.broadcast %cst_20 : f32 to vector<4x16x16xf32>
    %54 = arith.mulf %52, %53 : vector<4x16x16xf32>
    %55 = vector.shape_cast %9 : vector<16x16xf32> to vector<1x16x16xf32>
    %56 = vector.broadcast %55 : vector<1x16x16xf32> to vector<4x16x16xf32>
    %57 = arith.addf %54, %56 : vector<4x16x16xf32>
    %cst_21 = arith.constant dense<0xFF800000> : vector<4x16xf32>
    %58 = vector.multi_reduction <maximumf>, %57, %cst_21 [2] : vector<4x16x16xf32> to vector<4x16xf32>
    %59 = vector.shape_cast %58 : vector<4x16xf32> to vector<4x16x1xf32>
    %60 = vector.broadcast %59 : vector<4x16x1xf32> to vector<4x16x16xf32>
    %61 = arith.subf %57, %60 : vector<4x16x16xf32>
    %62 = math.exp %61 : vector<4x16x16xf32>
    %cst_22 = arith.constant dense<0.000000e+00> : vector<4x16xf32>
    %63 = vector.multi_reduction <add>, %62, %cst_22 [2] : vector<4x16x16xf32> to vector<4x16xf32>
    %64 = vector.shape_cast %63 : vector<4x16xf32> to vector<4x16x1xf32>
    %65 = tpu.reciprocal %64 {approx = true} : vector<4x16x1xf32> -> vector<4x16x1xf32>
    %66 = vector.broadcast %65 : vector<4x16x1xf32> to vector<4x16x16xf32>
    %67 = arith.mulf %62, %66 : vector<4x16x16xf32>
    "tpu.trace_start"() <{level = 10 : i32, message = "hqk,hkd->hqd"}> : () -> ()
    %cst_23 = arith.constant dense<0.000000e+00> : vector<4x16x8xf32>
    %68 = tpu.matmul %67, %51, %cst_23 {dimension_numbers = #tpu.dot_dimension_numbers<[2], [1], [1], [2], [0, 0, 0, 1, 1, 2], [0], [0]>} : vector<4x16x16xf32>, vector<4x16x8xf32>, vector<4x16x8xf32> -> vector<4x16x8xf32>
    "tpu.trace_stop"() : () -> ()
    %69 = vector.extract_strided_slice %68 {offsets = [0, 0, 0], sizes = [1, 16, 8], strides = [1, 1, 1]} : vector<4x16x8xf32> to vector<1x16x8xf32>
    %70 = vector.shape_cast %69 : vector<1x16x8xf32> to vector<16x8xf32>
    %71 = vector.extract_strided_slice %68 {offsets = [1, 0, 0], sizes = [1, 16, 8], strides = [1, 1, 1]} : vector<4x16x8xf32> to vector<1x16x8xf32>
    %72 = vector.shape_cast %71 : vector<1x16x8xf32> to vector<16x8xf32>
    %73 = vector.extract_strided_slice %68 {offsets = [2, 0, 0], sizes = [1, 16, 8], strides = [1, 1, 1]} : vector<4x16x8xf32> to vector<1x16x8xf32>
    %74 = vector.shape_cast %73 : vector<1x16x8xf32> to vector<16x8xf32>
    %75 = vector.extract_strided_slice %68 {offsets = [3, 0, 0], sizes = [1, 16, 8], strides = [1, 1, 1]} : vector<4x16x8xf32> to vector<1x16x8xf32>
    %76 = vector.shape_cast %75 : vector<1x16x8xf32> to vector<16x8xf32>
    %77 = tpu.concatenate %70, %72, %74, %76 in 1 : vector<16x8xf32>, vector<16x8xf32>, vector<16x8xf32>, vector<16x8xf32> -> vector<16x32xf32>
    %c0_24 = arith.constant 0 : index
    %c0_25 = arith.constant 0 : index
    %c0_26 = arith.constant 0 : index
    %78 = vector.load %arg7[%c0_24, %c0_25, %c0_26] : memref<2x32x32xf32, #tpu.memory_space<vmem>>, vector<1x32x32xf32>
    %79 = vector.shape_cast %78 : vector<1x32x32xf32> to vector<32x32xf32>
    %cst_27 = arith.constant dense<0.000000e+00> : vector<16x32xf32>
    %80 = tpu.matmul %77, %79, %cst_27 {dimension_numbers = #tpu.dot_dimension_numbers<[1], [0], [0], [1], [0, 0, 1, 1], [], []>} : vector<16x32xf32>, vector<32x32xf32>, vector<16x32xf32> -> vector<16x32xf32>
    %81 = vector.broadcast %12 : vector<1x32xf32> to vector<16x32xf32>
    %82 = arith.addf %80, %81 : vector<16x32xf32>
    %83 = arith.addf %8, %82 : vector<16x32xf32>
    %cst_28 = arith.constant dense<0.000000e+00> : vector<16xf32>
    %84 = vector.multi_reduction <add>, %83, %cst_28 [1] : vector<16x32xf32> to vector<16xf32>
    %85 = vector.shape_cast %84 : vector<16xf32> to vector<16x1xf32>
    %cst_29 = arith.constant 3.200000e+01 : f32
    %86 = vector.broadcast %cst_29 : f32 to vector<16x1xf32>
    %87 = arith.divf %85, %86 : vector<16x1xf32>
    %88 = arith.mulf %83, %83 : vector<16x32xf32>
    %cst_30 = arith.constant dense<0.000000e+00> : vector<16xf32>
    %89 = vector.multi_reduction <add>, %88, %cst_30 [1] : vector<16x32xf32> to vector<16xf32>
    %90 = vector.shape_cast %89 : vector<16xf32> to vector<16x1xf32>
    %cst_31 = arith.constant 3.200000e+01 : f32
    %91 = vector.broadcast %cst_31 : f32 to vector<16x1xf32>
    %92 = arith.divf %90, %91 : vector<16x1xf32>
    %93 = vector.broadcast %87 : vector<16x1xf32> to vector<16x32xf32>
    %94 = arith.subf %83, %93 : vector<16x32xf32>
    %95 = arith.mulf %87, %87 : vector<16x1xf32>
    %96 = arith.subf %92, %95 : vector<16x1xf32>
    %cst_32 = arith.constant 9.99999974E-6 : f32
    %97 = vector.broadcast %cst_32 : f32 to vector<16x1xf32>
    %98 = arith.addf %96, %97 : vector<16x1xf32>
    %99 = math.rsqrt %98 : vector<16x1xf32>
    %100 = vector.broadcast %99 : vector<16x1xf32> to vector<16x32xf32>
    %101 = arith.mulf %94, %100 : vector<16x32xf32>
    %102 = vector.broadcast %13 : vector<1x32xf32> to vector<16x32xf32>
    %103 = arith.mulf %101, %102 : vector<16x32xf32>
    %104 = vector.broadcast %14 : vector<1x32xf32> to vector<16x32xf32>
    %105 = arith.addf %103, %104 : vector<16x32xf32>
    %c0_33 = arith.constant 0 : index
    %c0_34 = arith.constant 0 : index
    %c0_35 = arith.constant 0 : index
    %106 = vector.load %arg9[%c0_33, %c0_34, %c0_35] : memref<2x32x64xf32, #tpu.memory_space<vmem>>, vector<1x32x64xf32>
    %107 = vector.shape_cast %106 : vector<1x32x64xf32> to vector<32x64xf32>
    %cst_36 = arith.constant dense<0.000000e+00> : vector<16x64xf32>
    %108 = tpu.matmul %105, %107, %cst_36 {dimension_numbers = #tpu.dot_dimension_numbers<[1], [0], [0], [1], [0, 0, 1, 1], [], []>} : vector<16x32xf32>, vector<32x64xf32>, vector<16x64xf32> -> vector<16x64xf32>
    %c0_37 = arith.constant 0 : index
    %c0_38 = arith.constant 0 : index
    %c0_39 = arith.constant 0 : index
    %109 = vector.load %arg10[%c0_37, %c0_38, %c0_39] : memref<2x1x64xf32, #tpu.memory_space<vmem>>, vector<1x1x64xf32>
    %110 = vector.shape_cast %109 : vector<1x1x64xf32> to vector<1x64xf32>
    %111 = vector.broadcast %110 : vector<1x64xf32> to vector<16x64xf32>
    %112 = arith.addf %108, %111 : vector<16x64xf32>
    %cst_40 = arith.constant 0.000000e+00 : f32
    %113 = vector.broadcast %cst_40 : f32 to vector<16x64xf32>
    %114 = arith.maximumf %112, %113 : vector<16x64xf32>
    %c0_41 = arith.constant 0 : index
    %c0_42 = arith.constant 0 : index
    %c0_43 = arith.constant 0 : index
    %115 = vector.load %arg11[%c0_41, %c0_42, %c0_43] : memref<2x64x32xf32, #tpu.memory_space<vmem>>, vector<1x64x32xf32>
    %116 = vector.shape_cast %115 : vector<1x64x32xf32> to vector<64x32xf32>
    %cst_44 = arith.constant dense<0.000000e+00> : vector<16x32xf32>
    %117 = tpu.matmul %114, %116, %cst_44 {dimension_numbers = #tpu.dot_dimension_numbers<[1], [0], [0], [1], [0, 0, 1, 1], [], []>} : vector<16x64xf32>, vector<64x32xf32>, vector<16x32xf32> -> vector<16x32xf32>
    %118 = vector.broadcast %15 : vector<1x32xf32> to vector<16x32xf32>
    %119 = arith.addf %117, %118 : vector<16x32xf32>
    %120 = arith.addf %105, %119 : vector<16x32xf32>
    %cst_45 = arith.constant dense<0.000000e+00> : vector<16xf32>
    %121 = vector.multi_reduction <add>, %120, %cst_45 [1] : vector<16x32xf32> to vector<16xf32>
    %122 = vector.shape_cast %121 : vector<16xf32> to vector<16x1xf32>
    %cst_46 = arith.constant 3.200000e+01 : f32
    %123 = vector.broadcast %cst_46 : f32 to vector<16x1xf32>
    %124 = arith.divf %122, %123 : vector<16x1xf32>
    %125 = arith.mulf %120, %120 : vector<16x32xf32>
    %cst_47 = arith.constant dense<0.000000e+00> : vector<16xf32>
    %126 = vector.multi_reduction <add>, %125, %cst_47 [1] : vector<16x32xf32> to vector<16xf32>
    %127 = vector.shape_cast %126 : vector<16xf32> to vector<16x1xf32>
    %cst_48 = arith.constant 3.200000e+01 : f32
    %128 = vector.broadcast %cst_48 : f32 to vector<16x1xf32>
    %129 = arith.divf %127, %128 : vector<16x1xf32>
    %130 = vector.broadcast %124 : vector<16x1xf32> to vector<16x32xf32>
    %131 = arith.subf %120, %130 : vector<16x32xf32>
    %132 = arith.mulf %124, %124 : vector<16x1xf32>
    %133 = arith.subf %129, %132 : vector<16x1xf32>
    %cst_49 = arith.constant 9.99999974E-6 : f32
    %134 = vector.broadcast %cst_49 : f32 to vector<16x1xf32>
    %135 = arith.addf %133, %134 : vector<16x1xf32>
    %136 = math.rsqrt %135 : vector<16x1xf32>
    %137 = vector.broadcast %136 : vector<16x1xf32> to vector<16x32xf32>
    %138 = arith.mulf %131, %137 : vector<16x32xf32>
    %139 = vector.broadcast %16 : vector<1x32xf32> to vector<16x32xf32>
    %140 = arith.mulf %138, %139 : vector<16x32xf32>
    %141 = vector.broadcast %17 : vector<1x32xf32> to vector<16x32xf32>
    %142 = arith.addf %140, %141 : vector<16x32xf32>
    %c1 = arith.constant 1 : index
    %c0_50 = arith.constant 0 : index
    %c0_51 = arith.constant 0 : index
    %143 = vector.load %arg8[%c1, %c0_50, %c0_51] : memref<2x8x32xf32, #tpu.memory_space<vmem>>, vector<1x8x32xf32>
    %144 = vector.shape_cast %143 : vector<1x8x32xf32> to vector<8x32xf32>
    %145 = vector.extract_strided_slice %144 {offsets = [0, 0], sizes = [1, 32], strides = [1, 1]} : vector<8x32xf32> to vector<1x32xf32>
    %146 = vector.extract_strided_slice %144 {offsets = [1, 0], sizes = [1, 32], strides = [1, 1]} : vector<8x32xf32> to vector<1x32xf32>
    %147 = vector.extract_strided_slice %144 {offsets = [2, 0], sizes = [1, 32], strides = [1, 1]} : vector<8x32xf32> to vector<1x32xf32>
    %148 = vector.extract_strided_slice %144 {offsets = [3, 0], sizes = [1, 32], strides = [1, 1]} : vector<8x32xf32> to vector<1x32xf32>
    %149 = vector.extract_strided_slice %144 {offsets = [4, 0], sizes = [1, 32], strides = [1, 1]} : vector<8x32xf32> to vector<1x32xf32>
    %150 = vector.extract_strided_slice %144 {offsets = [5, 0], sizes = [1, 32], strides = [1, 1]} : vector<8x32xf32> to vector<1x32xf32>
    %c1_52 = arith.constant 1 : index
    %c0_53 = arith.constant 0 : index
    %c0_54 = arith.constant 0 : index
    %151 = vector.load %arg5[%c1_52, %c0_53, %c0_54] : memref<2x32x96xf32, #tpu.memory_space<vmem>>, vector<1x32x96xf32>
    %152 = vector.shape_cast %151 : vector<1x32x96xf32> to vector<32x96xf32>
    %cst_55 = arith.constant dense<0.000000e+00> : vector<16x96xf32>
    %153 = tpu.matmul %142, %152, %cst_55 {dimension_numbers = #tpu.dot_dimension_numbers<[1], [0], [0], [1], [0, 0, 1, 1], [], []>} : vector<16x32xf32>, vector<32x96xf32>, vector<16x96xf32> -> vector<16x96xf32>
    %c1_56 = arith.constant 1 : index
    %c0_57 = arith.constant 0 : index
    %c0_58 = arith.constant 0 : index
    %154 = vector.load %arg6[%c1_56, %c0_57, %c0_58] : memref<2x1x96xf32, #tpu.memory_space<vmem>>, vector<1x1x96xf32>
    %155 = vector.shape_cast %154 : vector<1x1x96xf32> to vector<1x96xf32>
    %156 = vector.broadcast %155 : vector<1x96xf32> to vector<16x96xf32>
    %157 = arith.addf %153, %156 : vector<16x96xf32>
    %158 = vector.extract_strided_slice %157 {offsets = [0, 0], sizes = [16, 8], strides = [1, 1]} : vector<16x96xf32> to vector<16x8xf32>
    %159 = vector.extract_strided_slice %157 {offsets = [0, 8], sizes = [16, 8], strides = [1, 1]} : vector<16x96xf32> to vector<16x8xf32>
    %160 = vector.extract_strided_slice %157 {offsets = [0, 16], sizes = [16, 8], strides = [1, 1]} : vector<16x96xf32> to vector<16x8xf32>
    %161 = vector.extract_strided_slice %157 {offsets = [0, 24], sizes = [16, 8], strides = [1, 1]} : vector<16x96xf32> to vector<16x8xf32>
    %162 = vector.shape_cast %158 : vector<16x8xf32> to vector<1x16x8xf32>
    %163 = vector.shape_cast %159 : vector<16x8xf32> to vector<1x16x8xf32>
    %164 = vector.shape_cast %160 : vector<16x8xf32> to vector<1x16x8xf32>
    %165 = vector.shape_cast %161 : vector<16x8xf32> to vector<1x16x8xf32>
    %166 = tpu.concatenate %162, %163, %164, %165 in 0 : vector<1x16x8xf32>, vector<1x16x8xf32>, vector<1x16x8xf32>, vector<1x16x8xf32> -> vector<4x16x8xf32>
    %167 = vector.extract_strided_slice %157 {offsets = [0, 32], sizes = [16, 8], strides = [1, 1]} : vector<16x96xf32> to vector<16x8xf32>
    %168 = vector.extract_strided_slice %157 {offsets = [0, 40], sizes = [16, 8], strides = [1, 1]} : vector<16x96xf32> to vector<16x8xf32>
    %169 = vector.extract_strided_slice %157 {offsets = [0, 48], sizes = [16, 8], strides = [1, 1]} : vector<16x96xf32> to vector<16x8xf32>
    %170 = vector.extract_strided_slice %157 {offsets = [0, 56], sizes = [16, 8], strides = [1, 1]} : vector<16x96xf32> to vector<16x8xf32>
    %171 = vector.shape_cast %167 : vector<16x8xf32> to vector<1x16x8xf32>
    %172 = vector.shape_cast %168 : vector<16x8xf32> to vector<1x16x8xf32>
    %173 = vector.shape_cast %169 : vector<16x8xf32> to vector<1x16x8xf32>
    %174 = vector.shape_cast %170 : vector<16x8xf32> to vector<1x16x8xf32>
    %175 = tpu.concatenate %171, %172, %173, %174 in 0 : vector<1x16x8xf32>, vector<1x16x8xf32>, vector<1x16x8xf32>, vector<1x16x8xf32> -> vector<4x16x8xf32>
    %176 = vector.extract_strided_slice %157 {offsets = [0, 64], sizes = [16, 8], strides = [1, 1]} : vector<16x96xf32> to vector<16x8xf32>
    %177 = vector.extract_strided_slice %157 {offsets = [0, 72], sizes = [16, 8], strides = [1, 1]} : vector<16x96xf32> to vector<16x8xf32>
    %178 = vector.extract_strided_slice %157 {offsets = [0, 80], sizes = [16, 8], strides = [1, 1]} : vector<16x96xf32> to vector<16x8xf32>
    %179 = vector.extract_strided_slice %157 {offsets = [0, 88], sizes = [16, 8], strides = [1, 1]} : vector<16x96xf32> to vector<16x8xf32>
    %180 = vector.shape_cast %176 : vector<16x8xf32> to vector<1x16x8xf32>
    %181 = vector.shape_cast %177 : vector<16x8xf32> to vector<1x16x8xf32>
    %182 = vector.shape_cast %178 : vector<16x8xf32> to vector<1x16x8xf32>
    %183 = vector.shape_cast %179 : vector<16x8xf32> to vector<1x16x8xf32>
    %184 = tpu.concatenate %180, %181, %182, %183 in 0 : vector<1x16x8xf32>, vector<1x16x8xf32>, vector<1x16x8xf32>, vector<1x16x8xf32> -> vector<4x16x8xf32>
    "tpu.trace_start"() <{level = 10 : i32, message = "hqd,hkd->hqk"}> : () -> ()
    %cst_59 = arith.constant dense<0.000000e+00> : vector<4x16x16xf32>
    %185 = tpu.matmul %166, %175, %cst_59 {dimension_numbers = #tpu.dot_dimension_numbers<[2], [2], [1], [1], [0, 0, 0, 1, 1, 1], [0], [0]>} : vector<4x16x8xf32>, vector<4x16x8xf32>, vector<4x16x16xf32> -> vector<4x16x16xf32>
    "tpu.trace_stop"() : () -> ()
    %cst_60 = arith.constant 0.353553385 : f32
    %186 = vector.broadcast %cst_60 : f32 to vector<4x16x16xf32>
    %187 = arith.mulf %185, %186 : vector<4x16x16xf32>
    %188 = vector.shape_cast %9 : vector<16x16xf32> to vector<1x16x16xf32>
    %189 = vector.broadcast %188 : vector<1x16x16xf32> to vector<4x16x16xf32>
    %190 = arith.addf %187, %189 : vector<4x16x16xf32>
    %cst_61 = arith.constant dense<0xFF800000> : vector<4x16xf32>
    %191 = vector.multi_reduction <maximumf>, %190, %cst_61 [2] : vector<4x16x16xf32> to vector<4x16xf32>
    %192 = vector.shape_cast %191 : vector<4x16xf32> to vector<4x16x1xf32>
    %193 = vector.broadcast %192 : vector<4x16x1xf32> to vector<4x16x16xf32>
    %194 = arith.subf %190, %193 : vector<4x16x16xf32>
    %195 = math.exp %194 : vector<4x16x16xf32>
    %cst_62 = arith.constant dense<0.000000e+00> : vector<4x16xf32>
    %196 = vector.multi_reduction <add>, %195, %cst_62 [2] : vector<4x16x16xf32> to vector<4x16xf32>
    %197 = vector.shape_cast %196 : vector<4x16xf32> to vector<4x16x1xf32>
    %198 = tpu.reciprocal %197 {approx = true} : vector<4x16x1xf32> -> vector<4x16x1xf32>
    %199 = vector.broadcast %198 : vector<4x16x1xf32> to vector<4x16x16xf32>
    %200 = arith.mulf %195, %199 : vector<4x16x16xf32>
    "tpu.trace_start"() <{level = 10 : i32, message = "hqk,hkd->hqd"}> : () -> ()
    %cst_63 = arith.constant dense<0.000000e+00> : vector<4x16x8xf32>
    %201 = tpu.matmul %200, %184, %cst_63 {dimension_numbers = #tpu.dot_dimension_numbers<[2], [1], [1], [2], [0, 0, 0, 1, 1, 2], [0], [0]>} : vector<4x16x16xf32>, vector<4x16x8xf32>, vector<4x16x8xf32> -> vector<4x16x8xf32>
    "tpu.trace_stop"() : () -> ()
    %202 = vector.extract_strided_slice %201 {offsets = [0, 0, 0], sizes = [1, 16, 8], strides = [1, 1, 1]} : vector<4x16x8xf32> to vector<1x16x8xf32>
    %203 = vector.shape_cast %202 : vector<1x16x8xf32> to vector<16x8xf32>
    %204 = vector.extract_strided_slice %201 {offsets = [1, 0, 0], sizes = [1, 16, 8], strides = [1, 1, 1]} : vector<4x16x8xf32> to vector<1x16x8xf32>
    %205 = vector.shape_cast %204 : vector<1x16x8xf32> to vector<16x8xf32>
    %206 = vector.extract_strided_slice %201 {offsets = [2, 0, 0], sizes = [1, 16, 8], strides = [1, 1, 1]} : vector<4x16x8xf32> to vector<1x16x8xf32>
    %207 = vector.shape_cast %206 : vector<1x16x8xf32> to vector<16x8xf32>
    %208 = vector.extract_strided_slice %201 {offsets = [3, 0, 0], sizes = [1, 16, 8], strides = [1, 1, 1]} : vector<4x16x8xf32> to vector<1x16x8xf32>
    %209 = vector.shape_cast %208 : vector<1x16x8xf32> to vector<16x8xf32>
    %210 = tpu.concatenate %203, %205, %207, %209 in 1 : vector<16x8xf32>, vector<16x8xf32>, vector<16x8xf32>, vector<16x8xf32> -> vector<16x32xf32>
    %c1_64 = arith.constant 1 : index
    %c0_65 = arith.constant 0 : index
    %c0_66 = arith.constant 0 : index
    %211 = vector.load %arg7[%c1_64, %c0_65, %c0_66] : memref<2x32x32xf32, #tpu.memory_space<vmem>>, vector<1x32x32xf32>
    %212 = vector.shape_cast %211 : vector<1x32x32xf32> to vector<32x32xf32>
    %cst_67 = arith.constant dense<0.000000e+00> : vector<16x32xf32>
    %213 = tpu.matmul %210, %212, %cst_67 {dimension_numbers = #tpu.dot_dimension_numbers<[1], [0], [0], [1], [0, 0, 1, 1], [], []>} : vector<16x32xf32>, vector<32x32xf32>, vector<16x32xf32> -> vector<16x32xf32>
    %214 = vector.broadcast %145 : vector<1x32xf32> to vector<16x32xf32>
    %215 = arith.addf %213, %214 : vector<16x32xf32>
    %216 = arith.addf %142, %215 : vector<16x32xf32>
    %cst_68 = arith.constant dense<0.000000e+00> : vector<16xf32>
    %217 = vector.multi_reduction <add>, %216, %cst_68 [1] : vector<16x32xf32> to vector<16xf32>
    %218 = vector.shape_cast %217 : vector<16xf32> to vector<16x1xf32>
    %cst_69 = arith.constant 3.200000e+01 : f32
    %219 = vector.broadcast %cst_69 : f32 to vector<16x1xf32>
    %220 = arith.divf %218, %219 : vector<16x1xf32>
    %221 = arith.mulf %216, %216 : vector<16x32xf32>
    %cst_70 = arith.constant dense<0.000000e+00> : vector<16xf32>
    %222 = vector.multi_reduction <add>, %221, %cst_70 [1] : vector<16x32xf32> to vector<16xf32>
    %223 = vector.shape_cast %222 : vector<16xf32> to vector<16x1xf32>
    %cst_71 = arith.constant 3.200000e+01 : f32
    %224 = vector.broadcast %cst_71 : f32 to vector<16x1xf32>
    %225 = arith.divf %223, %224 : vector<16x1xf32>
    %226 = vector.broadcast %220 : vector<16x1xf32> to vector<16x32xf32>
    %227 = arith.subf %216, %226 : vector<16x32xf32>
    %228 = arith.mulf %220, %220 : vector<16x1xf32>
    %229 = arith.subf %225, %228 : vector<16x1xf32>
    %cst_72 = arith.constant 9.99999974E-6 : f32
    %230 = vector.broadcast %cst_72 : f32 to vector<16x1xf32>
    %231 = arith.addf %229, %230 : vector<16x1xf32>
    %232 = math.rsqrt %231 : vector<16x1xf32>
    %233 = vector.broadcast %232 : vector<16x1xf32> to vector<16x32xf32>
    %234 = arith.mulf %227, %233 : vector<16x32xf32>
    %235 = vector.broadcast %146 : vector<1x32xf32> to vector<16x32xf32>
    %236 = arith.mulf %234, %235 : vector<16x32xf32>
    %237 = vector.broadcast %147 : vector<1x32xf32> to vector<16x32xf32>
    %238 = arith.addf %236, %237 : vector<16x32xf32>
    %c1_73 = arith.constant 1 : index
    %c0_74 = arith.constant 0 : index
    %c0_75 = arith.constant 0 : index
    %239 = vector.load %arg9[%c1_73, %c0_74, %c0_75] : memref<2x32x64xf32, #tpu.memory_space<vmem>>, vector<1x32x64xf32>
    %240 = vector.shape_cast %239 : vector<1x32x64xf32> to vector<32x64xf32>
    %cst_76 = arith.constant dense<0.000000e+00> : vector<16x64xf32>
    %241 = tpu.matmul %238, %240, %cst_76 {dimension_numbers = #tpu.dot_dimension_numbers<[1], [0], [0], [1], [0, 0, 1, 1], [], []>} : vector<16x32xf32>, vector<32x64xf32>, vector<16x64xf32> -> vector<16x64xf32>
    %c1_77 = arith.constant 1 : index
    %c0_78 = arith.constant 0 : index
    %c0_79 = arith.constant 0 : index
    %242 = vector.load %arg10[%c1_77, %c0_78, %c0_79] : memref<2x1x64xf32, #tpu.memory_space<vmem>>, vector<1x1x64xf32>
    %243 = vector.shape_cast %242 : vector<1x1x64xf32> to vector<1x64xf32>
    %244 = vector.broadcast %243 : vector<1x64xf32> to vector<16x64xf32>
    %245 = arith.addf %241, %244 : vector<16x64xf32>
    %cst_80 = arith.constant 0.000000e+00 : f32
    %246 = vector.broadcast %cst_80 : f32 to vector<16x64xf32>
    %247 = arith.maximumf %245, %246 : vector<16x64xf32>
    %c1_81 = arith.constant 1 : index
    %c0_82 = arith.constant 0 : index
    %c0_83 = arith.constant 0 : index
    %248 = vector.load %arg11[%c1_81, %c0_82, %c0_83] : memref<2x64x32xf32, #tpu.memory_space<vmem>>, vector<1x64x32xf32>
    %249 = vector.shape_cast %248 : vector<1x64x32xf32> to vector<64x32xf32>
    %cst_84 = arith.constant dense<0.000000e+00> : vector<16x32xf32>
    %250 = tpu.matmul %247, %249, %cst_84 {dimension_numbers = #tpu.dot_dimension_numbers<[1], [0], [0], [1], [0, 0, 1, 1], [], []>} : vector<16x64xf32>, vector<64x32xf32>, vector<16x32xf32> -> vector<16x32xf32>
    %251 = vector.broadcast %148 : vector<1x32xf32> to vector<16x32xf32>
    %252 = arith.addf %250, %251 : vector<16x32xf32>
    %253 = arith.addf %238, %252 : vector<16x32xf32>
    %cst_85 = arith.constant dense<0.000000e+00> : vector<16xf32>
    %254 = vector.multi_reduction <add>, %253, %cst_85 [1] : vector<16x32xf32> to vector<16xf32>
    %255 = vector.shape_cast %254 : vector<16xf32> to vector<16x1xf32>
    %cst_86 = arith.constant 3.200000e+01 : f32
    %256 = vector.broadcast %cst_86 : f32 to vector<16x1xf32>
    %257 = arith.divf %255, %256 : vector<16x1xf32>
    %258 = arith.mulf %253, %253 : vector<16x32xf32>
    %cst_87 = arith.constant dense<0.000000e+00> : vector<16xf32>
    %259 = vector.multi_reduction <add>, %258, %cst_87 [1] : vector<16x32xf32> to vector<16xf32>
    %260 = vector.shape_cast %259 : vector<16xf32> to vector<16x1xf32>
    %cst_88 = arith.constant 3.200000e+01 : f32
    %261 = vector.broadcast %cst_88 : f32 to vector<16x1xf32>
    %262 = arith.divf %260, %261 : vector<16x1xf32>
    %263 = vector.broadcast %257 : vector<16x1xf32> to vector<16x32xf32>
    %264 = arith.subf %253, %263 : vector<16x32xf32>
    %265 = arith.mulf %257, %257 : vector<16x1xf32>
    %266 = arith.subf %262, %265 : vector<16x1xf32>
    %cst_89 = arith.constant 9.99999974E-6 : f32
    %267 = vector.broadcast %cst_89 : f32 to vector<16x1xf32>
    %268 = arith.addf %266, %267 : vector<16x1xf32>
    %269 = math.rsqrt %268 : vector<16x1xf32>
    %270 = vector.broadcast %269 : vector<16x1xf32> to vector<16x32xf32>
    %271 = arith.mulf %264, %270 : vector<16x32xf32>
    %272 = vector.broadcast %149 : vector<1x32xf32> to vector<16x32xf32>
    %273 = arith.mulf %271, %272 : vector<16x32xf32>
    %274 = vector.broadcast %150 : vector<1x32xf32> to vector<16x32xf32>
    %275 = arith.addf %273, %274 : vector<16x32xf32>
    %276 = vector.extract_strided_slice %275 {offsets = [0, 0], sizes = [1, 32], strides = [1, 1]} : vector<16x32xf32> to vector<1x32xf32>
    %277 = vector.extract_strided_slice %275 {offsets = [1, 0], sizes = [1, 32], strides = [1, 1]} : vector<16x32xf32> to vector<1x32xf32>
    %278 = vector.extract_strided_slice %275 {offsets = [2, 0], sizes = [1, 32], strides = [1, 1]} : vector<16x32xf32> to vector<1x32xf32>
    %279 = vector.extract_strided_slice %275 {offsets = [3, 0], sizes = [1, 32], strides = [1, 1]} : vector<16x32xf32> to vector<1x32xf32>
    %280 = vector.extract_strided_slice %275 {offsets = [4, 0], sizes = [1, 32], strides = [1, 1]} : vector<16x32xf32> to vector<1x32xf32>
    %281 = vector.extract_strided_slice %275 {offsets = [5, 0], sizes = [1, 32], strides = [1, 1]} : vector<16x32xf32> to vector<1x32xf32>
    %282 = vector.extract_strided_slice %275 {offsets = [6, 0], sizes = [1, 32], strides = [1, 1]} : vector<16x32xf32> to vector<1x32xf32>
    %283 = vector.extract_strided_slice %275 {offsets = [7, 0], sizes = [1, 32], strides = [1, 1]} : vector<16x32xf32> to vector<1x32xf32>
    %284 = tpu.concatenate %276, %277, %278, %279, %280, %281, %282, %283 in 1 : vector<1x32xf32>, vector<1x32xf32>, vector<1x32xf32>, vector<1x32xf32>, vector<1x32xf32>, vector<1x32xf32>, vector<1x32xf32>, vector<1x32xf32> -> vector<1x256xf32>
    %285 = vector.extract_strided_slice %275 {offsets = [8, 0], sizes = [1, 32], strides = [1, 1]} : vector<16x32xf32> to vector<1x32xf32>
    %286 = vector.extract_strided_slice %275 {offsets = [9, 0], sizes = [1, 32], strides = [1, 1]} : vector<16x32xf32> to vector<1x32xf32>
    %287 = vector.extract_strided_slice %275 {offsets = [10, 0], sizes = [1, 32], strides = [1, 1]} : vector<16x32xf32> to vector<1x32xf32>
    %288 = vector.extract_strided_slice %275 {offsets = [11, 0], sizes = [1, 32], strides = [1, 1]} : vector<16x32xf32> to vector<1x32xf32>
    %289 = vector.extract_strided_slice %275 {offsets = [12, 0], sizes = [1, 32], strides = [1, 1]} : vector<16x32xf32> to vector<1x32xf32>
    %290 = vector.extract_strided_slice %275 {offsets = [13, 0], sizes = [1, 32], strides = [1, 1]} : vector<16x32xf32> to vector<1x32xf32>
    %291 = vector.extract_strided_slice %275 {offsets = [14, 0], sizes = [1, 32], strides = [1, 1]} : vector<16x32xf32> to vector<1x32xf32>
    %292 = vector.extract_strided_slice %275 {offsets = [15, 0], sizes = [1, 32], strides = [1, 1]} : vector<16x32xf32> to vector<1x32xf32>
    %293 = tpu.concatenate %285, %286, %287, %288, %289, %290, %291, %292 in 1 : vector<1x32xf32>, vector<1x32xf32>, vector<1x32xf32>, vector<1x32xf32>, vector<1x32xf32>, vector<1x32xf32>, vector<1x32xf32>, vector<1x32xf32> -> vector<1x256xf32>
    %294 = tpu.concatenate %284, %293 in 0 : vector<1x256xf32>, vector<1x256xf32> -> vector<2x256xf32>
    %c0_90 = arith.constant 0 : index
    %c0_91 = arith.constant 0 : index
    %295 = vector.load %arg12[%c0_90, %c0_91] : memref<256x128xf32, #tpu.memory_space<vmem>>, vector<256x128xf32>
    %cst_92 = arith.constant dense<0.000000e+00> : vector<2x128xf32>
    %296 = tpu.matmul %294, %295, %cst_92 {dimension_numbers = #tpu.dot_dimension_numbers<[1], [0], [0], [1], [0, 0, 1, 1], [], []>} : vector<2x256xf32>, vector<256x128xf32>, vector<2x128xf32> -> vector<2x128xf32>
    %c0_93 = arith.constant 0 : index
    %c0_94 = arith.constant 0 : index
    %297 = vector.load %arg13[%c0_93, %c0_94] : memref<1x128xf32, #tpu.memory_space<vmem>>, vector<1x128xf32>
    %298 = vector.broadcast %297 : vector<1x128xf32> to vector<2x128xf32>
    %299 = arith.addf %296, %298 : vector<2x128xf32>
    %c0_95 = arith.constant 0 : index
    %c0_96 = arith.constant 0 : index
    %300 = vector.load %arg14[%c0_95, %c0_96] : memref<2x128xf32, #tpu.memory_space<vmem>>, vector<2x128xf32>
    tpu.vector_store %arg14[%c0_95, %c0_96], %299 {strides = array<i32>} : memref<2x128xf32, #tpu.memory_space<vmem>>, vector<2x128xf32>,
    return
  }
}

</mosaic_0001>

<bundles_post_ra>
// kernel: fwd.1
= control target key start
LH: loop header
LB: loop body
LE: loop exit
PB: predicated region body
PF: predicated region fallthrough
CT: control target
= control target key end

     0   :  { %vm62_vm0 = vcmask 1043456   ;;  %vm55_vm1 = vcmask 97280   ;;  %vm103_vm2 = vcmask 261120   ;;  %s1909_s16 = smov 120   ;;  %s1910_s17 = smov 104   ;;  %vm151_vm3 = vcmask 64512   ;;  %s2693_s3 = inlined_call_operand.vmem [shape: f32[12,32], index: 3, kind: input, shape index: {}]   ;;  %s2694_s0 = inlined_call_operand.vmem [shape: f32[16,12], index: 0, kind: input, shape index: {}]   ;;  %s2695_s5 = inlined_call_operand.vmem [shape: f32[2,32,96], index: 5, kind: input, shape index: {}]   ;;  %s2696_s4 = inlined_call_operand.vmem [shape: f32[1,32], index: 4, kind: input, shape index: {}]   ;;  %s2697_s6 = inlined_call_operand.vmem [shape: f32[2,1,96], index: 6, kind: input, shape index: {}]   ;;  %s2698_s1 = inlined_call_operand.vmem [shape: f32[8,32], index: 1, kind: input, shape index: {}]   ;;  %s2699_s2 = inlined_call_operand.vmem [shape: f32[16,16], index: 2, kind: input, shape index: {}]   ;;  %s2700_s7 = inlined_call_operand.vmem [shape: f32[2,32,32], index: 7, kind: input, shape index: {}]   ;;  %s2701_s8 = inlined_call_operand.vmem [shape: f32[2,8,32], index: 8, kind: input, shape index: {}]   ;;  %s2702_s10 = inlined_call_operand.vmem [shape: f32[2,1,64], index: 10, kind: input, shape index: {}]   ;;  %s2703_s9 = inlined_call_operand.vmem [shape: f32[2,32,64], index: 9, kind: input, shape index: {}]   ;;  %s2704_s11 = inlined_call_operand.vmem [shape: f32[2,64,32], index: 11, kind: input, shape index: {}]   ;;  %s2705_s12 = inlined_call_operand.vmem [shape: f32[256,128], index: 12, kind: input, shape index: {}]   ;;  %s2706_s13 = inlined_call_operand.vmem [shape: f32[1,128], index: 13, kind: input, shape index: {}]   ;;  %s2707_s14 = inlined_call_operand.vmem [shape: f32[2,128], index: 14, kind: output, shape index: {}]  }
   0x1   :  { %v50_v0 = vld [vmem:[%s2693_s3 + $0x8] sm:$0xf]  ;;  %v49_v1 = vld [vmem:[%s2693_s3] sm:$0xff]  ;;  %v98_v3 = vld [vmem:[%s2695_s5 + $0x18] sm:$0xff]  ;;  %s1911_s18 = smov 96   ;;  %vm304_vm4 = vcmask 130048  }
   0x2   :  { %1648 = vmatpush.msk.msra.mxu0 %vm62_vm0, %v50_v0  ;;  %v47_v2 = vld [vmem:[%s2694_s0] sm:$0xff]  ;;  %122 = vmatpush.msra.mxu3 %v98_v3  ;;  %v48_v4 = vld [vmem:[%s2694_s0 + $0x8] sm:$0xff]  ;;  %v97_v5 = vld [vmem:[%s2695_s5 + $0x10] sm:$0xff]  ;;  %s1913_s23 = smov 16   ;;  %s1914_s3 = smov 8   ;;  %vm561_vm5 = vcmask 195584  }
   0x3   :  { %v96_v6 = vld [vmem:[%s2695_s5 + $0x8] sm:$0xff]  ;;  %v95_v7 = vld [vmem:[%s2695_s5] sm:$0xff]  ;;  %s1915_s24 = smov 24   ;;  %vm709_vm13 = vcmask 523264  }
   0x4   :  { %81 = vmatpush.msra.mxu0 %v49_v1  ;;  %123 = vmatpush.msra.mxu3 %v97_v5  ;;  %v1820_v8 = vld [vmem:[%s2696_s4] ss:$0 sm:$0xff]  ;;  %v2115_v47 = vld [vmem:[%s2699_s2 + $0x8] sm:$0xff] }
   0x5   :  { %1649 = vmatmul.msk.f32.vlgmr.msra.gmra.mxu0 %vm55_vm1, %v47_v2  ;;  %v89_v10 = vld [vmem:[%s2698_s1] sm:$0xff]  ;;  %s1908_s1 = smov 112  }
   0x6   :  { %124 = vmatpush.msra.mxu3 %v96_v6  ;;  %v1821_v16 = vld [vmem:[%s2697_s6] ss:$0 sm:$0xff] }
   0x7   :  { %v2107_v38 = vld [vmem:[%s2699_s2] sm:$0xff]  ;;  %s1912_s2 = smov 64  }
   0x8   :  { %125 = vmatpush.msra.mxu3 %v95_v7 }
   0xd   :  { %1650 = vmatmul.msk.f32.gmra.mxu0 %vm55_vm1, %v48_v4 }
  0x82   :  { %v83_v9 = vpop.f32.mrf.mxu0 }
  0x83   :  { %v84_v11 = vadd.f32 %v1820_v8, %v83_v9 }
  0x85   :  { %v2023_v12 = vadd.f32 %v89_v10, %v84_v11 }
  0x87   :  { %1651 = vmatmul.msk.f32.vlgmr.msra.gmra.mxu3 %vm103_vm2, %v2023_v12 }
  0x8a   :  { %v86_v13 = vpop.f32.mrf.mxu0 }
  0x8b   :  { %v87_v14 = vadd.f32 %v1820_v8, %v86_v13 }
  0x8d   :  { %v2027_v15 = vadd.f32 %v89_v10, %v87_v14 }
  0x8f   :  { %1652 = vmatmul.msk.f32.gmra.mxu3 %vm103_vm2, %v2027_v15 }
 0x10a   :  { %v127_v17 = vpop.f32.mrf.mxu3 }
 0x10b   :  { %v2034_v18 = vadd.f32 %v1821_v16, %v127_v17 }
 0x10d   :  { %139 = vrot.lane.b32.xlu2 %v2034_v18, %s1908_s1 }
 0x112   :  { %v130_v19 = vpop.f32.mrf.mxu3 }
 0x113   :  { %v2038_v20 = vadd.f32 %v1821_v16, %v130_v19 }
 0x115   :  { %141 = vrot.lane.b32.xlu1 %v2038_v20, %s1908_s1  ;;  %137 = vrot.lane.b32.xlu0 %v2038_v20, %s1909_s16 }
 0x116   :  { %143 = vrot.lane.b32.xlu2 %v2034_v18, %s1910_s17 }
 0x11d   :  { %145 = vrot.lane.b32.xlu1 %v2038_v20, %s1910_s17  ;;  %135 = vrot.lane.b32.xlu0 %v2034_v18, %s1909_s16 }
 0x11e   :  { %149 = vrot.lane.b32.xlu2 %v2038_v20, %s1911_s18 }
 0x167   :  { %v2052_v21 = vpop.permute.xlu2 %139 }
 0x170   :  { %v2054_v22 = vpop.permute.xlu2 %143 }
 0x171   :  { %v1760_v7 = vpack.i.bf16 %v2054_v22, %v2052_v21 }
 0x178   :  { %v150_v23 = vpop.permute.xlu2 %149 }
 0x179   :  { %1653 = vmatpush.xpose.msk.msra.mxu1 %vm151_vm3, %v150_v23  ;;  %1738 = vmatpush.xpose.msk.msra.mxu2 %vm151_vm3, %v150_v23 }
 0x187   :  { %v2058_v24 = vpop.permute.xlu1 %141  ;;  %v2060_v25 = vpop.permute.xlu0 %137 }
 0x188   :  { %185 = vrot.lane.b32.xlu0 %v2060_v25, %s1911_s18 }
 0x18f   :  { %v2064_v26 = vpop.permute.xlu1 %145  ;;  %v2066_v27 = vpop.permute.xlu0 %135 }
 0x190   :  { %255 = vrot.lane.b32.xlu2 %v2064_v26, %s1911_s18  ;;  %147 = vrot.lane.b32.xlu0 %v2034_v18, %s1911_s18  ;;  %v1755_v5 = vpack.i.bf16 %v2064_v26, %v2058_v24  ;;  %v1750_v6 = vpack.i.bf16 %v2066_v27, %v2060_v25 }
 0x191   :  { %183 = vrot.lane.b32.xlu1 %v2066_v27, %s1911_s18 }
 0x198   :  { %218 = vrot.lane.b32.xlu0 %v2052_v21, %s1911_s18 }
 0x199   :  { %220 = vrot.lane.b32.xlu1 %v2058_v24, %s1911_s18 }
 0x1a1   :  { %253 = vrot.lane.b32.xlu1 %v2054_v22, %s1911_s18 }
 0x1ea   :  { %v256_v30 = vpop.permute.xlu2 %255 }
 0x1fa   :  { %v186_v28 = vpop.permute.xlu0 %185 }
 0x1fb   :  { %1657 = vmatpush.xpose.msk.msrb.mxu3 %vm151_vm3, %v186_v28 }
 0x202   :  { %v148_v29 = vpop.permute.xlu0 %147 }
 0x203   :  { %v184_v31 = vpop.permute.xlu1 %183  ;;  %1654 = vmatpush.xpose.msk.msra.mxu1 %vm151_vm3, %v148_v29  ;;  %1739 = vmatpush.xpose.msk.msra.mxu2 %vm151_vm3, %v148_v29 }
 0x204   :  { %1658 = vmatpush.xpose.msk.msrb.mxu3 %vm151_vm3, %v184_v31 }
 0x206   :  { %1655 = vmatmul.msk.f32.vlgmr.msra.gmra.mxu1 %vm151_vm3, %v2034_v18  ;;  %1656 = vmatmul.msk.f32.vlgmr.msra.gmra.mxu2 %vm151_vm3, %v2038_v20 }
 0x207   :  { %1665 = vmatpush.xpose.msk.msrb.mxu1 %vm151_vm3, %v256_v30  ;;  %1659 = vmatmul.msk.f32.vlgmr.msrb.gmra.mxu3 %vm151_vm3, %v2066_v27 }
 0x20a   :  { %v219_v33 = vpop.permute.xlu0 %218 }
 0x20b   :  { %v221_v32 = vpop.permute.xlu1 %220 }
 0x20c   :  { %1661 = vmatpush.xpose.msk.msrb.mxu0 %vm151_vm3, %v221_v32 }
 0x20f   :  { %1660 = vmatmul.msk.f32.gmra.mxu3 %vm151_vm3, %v2060_v25 }
 0x210   :  { %1662 = vmatpush.xpose.msk.msrb.mxu0 %vm151_vm3, %v219_v33 }
 0x213   :  { %v254_v34 = vpop.permute.xlu1 %253  ;;  %1663 = vmatmul.msk.f32.vlgmr.msrb.gmra.mxu0 %vm151_vm3, %v2052_v21 }
 0x214   :  { %1666 = vmatpush.xpose.msk.msrb.mxu1 %vm151_vm3, %v254_v34 }
 0x217   :  { %1667 = vmatmul.msk.f32.vlgmr.msrb.gmra.mxu1 %vm151_vm3, %v2054_v22 }
 0x21b   :  { %1664 = vmatmul.msk.f32.gmra.mxu0 %vm151_vm3, %v2058_v24 }
 0x21f   :  { %1668 = vmatmul.msk.f32.gmra.mxu1 %vm151_vm3, %v2064_v26 }
 0x283   :  { %v177_v37 = vpop.f32.mrf.mxu1 }
 0x284   :  { %v288_v51 = vmul.f32 0.35355338, %v177_v37 }
 0x286   :  { %v2123_v57 = vadd.f32 %v288_v51, %v2107_v38 }
 0x288   :  { %v305_v62 = vsel %vm304_vm4, %v2123_v57, -inf }
 0x289   :  { %v180_v61 = vpop.f32.mrf.mxu2 }
 0x28a   :  { %v212_v35 = vpop.f32.mrf.mxu3  ;;  %v289_v0 = vmul.f32 0.35355338, %v180_v61 }
 0x28b   :  { %v290_v36 = vmul.f32 0.35355338, %v212_v35 }
 0x28c   :  { %v297_v3 = vadd.f32 %v289_v0, %v2115_v47 }
 0x28d   :  { %v298_v39 = vadd.f32 %v290_v36, %v2107_v38 }
 0x28e   :  { %v308_v4 = vsel %vm304_vm4, %v297_v3, -inf }
 0x28f   :  { %v311_v40 = vsel %vm304_vm4, %v298_v39, -inf }
 0x290   :  { %312 = vmax.xlane.f32.xlu2 %v311_v40  ;;  %v247_v41 = vpop.f32.mrf.mxu0 }
 0x291   :  { %v292_v42 = vmul.f32 0.35355338, %v247_v41 }
 0x292   :  { %v215_v43 = vpop.f32.mrf.mxu3 }
 0x293   :  { %v291_v44 = vmul.f32 0.35355338, %v215_v43  ;;  %v300_v45 = vadd.f32 %v292_v42, %v2107_v38 }
 0x294   :  { %v282_v46 = vpop.f32.mrf.mxu1 }
 0x295   :  { %v294_v48 = vmul.f32 0.35355338, %v282_v46  ;;  %v317_v49 = vsel %vm304_vm4, %v300_v45, -inf  ;;  %v299_v50 = vadd.f32 %v291_v44, %v2115_v47 }
 0x296   :  { %318 = vmax.xlane.f32.xlu0 %v317_v49 }
 0x297   :  { %v314_v52 = vsel %vm304_vm4, %v299_v50, -inf  ;;  %v302_v53 = vadd.f32 %v294_v48, %v2107_v38 }
 0x298   :  { %315 = vmax.xlane.f32.xlu1 %v314_v52  ;;  %v250_v54 = vpop.f32.mrf.mxu0 }
 0x299   :  { %v293_v55 = vmul.f32 0.35355338, %v250_v54  ;;  %v323_v56 = vsel %vm304_vm4, %v302_v53, -inf }
 0x29a   :  { %324 = vmax.xlane.f32.xlu2 %v323_v56 }
 0x29b   :  { %v301_v60 = vadd.f32 %v293_v55, %v2115_v47 }
 0x29c   :  { %v285_v58 = vpop.f32.mrf.mxu1 }
 0x29d   :  { %v295_v59 = vmul.f32 0.35355338, %v285_v58  ;;  %v320_v2 = vsel %vm304_vm4, %v301_v60, -inf }
 0x29f   :  { %v303_v63 = vadd.f32 %v295_v59, %v2115_v47 }
 0x2a0   :  { %306 = vmax.xlane.f32.xlu1 %v305_v62 }
 0x2a1   :  { %v326_v1 = vsel %vm304_vm4, %v303_v63, -inf }
 0x2a2   :  { %327 = vmax.xlane.f32.xlu0 %v326_v1  ;;  %321 = vmax.xlane.f32.xlu2 %v320_v2 }
 0x2aa   :  { %309 = vmax.xlane.f32.xlu2 %v308_v4 }
 0x2b6   :  { %1756 = vrot.lane.b32.xlu0 %v1755_v5, %s1912_s2 }
 0x2c2   :  { %1751 = vrot.lane.b32.xlu2 %v1750_v6, %s1912_s2 }
 0x2ca   :  { %1761 = vrot.lane.b32.xlu2 %v1760_v7, %s1912_s2 }
 0x303   :  { %v313_v8 = vpop.xlane.xlu2 %312 }
 0x304   :  { %v331_v9 = vsub.f32 %v298_v39, %v313_v8 }
 0x306   :  { %v341_v10 = vmul.f32 1.442695, %v331_v9 }
 0x308   :  { %1826 = vpow2.f32 %v341_v10 }
 0x309   :  { %v319_v11 = vpop.xlane.xlu0 %318 }
 0x30a   :  { %v333_v13 = vsub.f32 %v300_v45, %v319_v11 }
 0x30b   :  { %v316_v14 = vpop.xlane.xlu1 %315 }
 0x30c   :  { %v345_v16 = vmul.f32 1.442695, %v333_v13  ;;  %v332_v17 = vsub.f32 %v299_v50, %v316_v14 }
 0x30d   :  { %v325_v19 = vpop.xlane.xlu2 %324 }
 0x30e   :  { %v2142_v23 = vpop.eup %1826  ;;  %1828 = vpow2.f32 %v345_v16  ;;  %v343_v24 = vmul.f32 1.442695, %v332_v17  ;;  %v335_v25 = vsub.f32 %v302_v53, %v325_v19 }
 0x30f   :  { %v359_v21 = vsel %vm304_vm4, %v2142_v23, 0.0 }
 0x310   :  { %1830 = vpow2.f32 %v343_v24  ;;  %v349_v22 = vmul.f32 1.442695, %v335_v25  ;;  %360 = vadd.xlane.f32.xlu0 %v359_v21 }
 0x312   :  { %1832 = vpow2.f32 %v349_v22 }
 0x313   :  { %v307_v42 = vpop.xlane.xlu1 %306 }
 0x314   :  { %v2146_v26 = vpop.eup %1828  ;;  %v329_v44 = vsub.f32 %v2123_v57, %v307_v42  ;;  %v1765_v57 = vpack.i.bf16 %v2034_v18, %v2038_v20 }
 0x315   :  { %v322_v27 = vpop.xlane.xlu2 %321  ;;  %v365_v28 = vsel %vm304_vm4, %v2146_v26, 0.0  ;;  %v328_v33 = vpop.xlane.xlu0 %327 }
 0x316   :  { %v2150_v29 = vpop.eup %1830  ;;  %v334_v30 = vsub.f32 %v301_v60, %v322_v27  ;;  %366 = vadd.xlane.f32.xlu1 %v365_v28  ;;  %v336_v35 = vsub.f32 %v303_v63, %v328_v33  ;;  %v337_v50 = vmul.f32 1.442695, %v329_v44 }
 0x317   :  { %v362_v31 = vsel %vm304_vm4, %v2150_v29, 0.0 }
 0x318   :  { %v347_v32 = vmul.f32 1.442695, %v334_v30  ;;  %363 = vadd.xlane.f32.xlu0 %v362_v31  ;;  %v1833_v34 = vpop.eup %1832  ;;  %v351_v40 = vmul.f32 1.442695, %v336_v35  ;;  %v567_v35 = vld [vmem:[%s2700_s7 + $0x18] sm:$0xff] }
 0x319   :  { %v371_v37 = vsel %vm304_vm4, %v1833_v34, 0.0 }
 0x31a   :  { %1834 = vpow2.f32 %v347_v32 }
 0x31d   :  { %v310_v36 = vpop.xlane.xlu2 %309 }
 0x31e   :  { %v330_v39 = vsub.f32 %v297_v3, %v310_v36  ;;  %372 = vadd.xlane.f32.xlu1 %v371_v37  ;;  %v566_v36 = vld [vmem:[%s2700_s7 + $0x10] sm:$0xff]  ;;  %v565_v37 = vld [vmem:[%s2700_s7 + $0x8] sm:$0xff] }
 0x320   :  { %v339_v41 = vmul.f32 1.442695, %v330_v39  ;;  %v1835_v43 = vpop.eup %1834  ;;  %v564_v39 = vld [vmem:[%s2700_s7] sm:$0xff] }
 0x321   :  { %v368_v46 = vsel %vm304_vm4, %v1835_v43, 0.0 }
 0x322   :  { %1836 = vpow2.f32 %v339_v41 }
 0x323   :  { %1838 = vpow2.f32 %v351_v40 }
 0x324   :  { %1840 = vpow2.f32 %v337_v50 }
 0x325   :  { %v1752_v45 = vpop.permute.xlu2 %1751 }
 0x326   :  { %v1753_v48 = vunpack.i.l.bf16 %v1752_v45  ;;  %369 = vadd.xlane.f32.xlu1 %v368_v46  ;;  %v1754_v51 = vunpack.i.h.bf16 %v1752_v45 }
 0x328   :  { %v2157_v49 = vpop.eup %1836  ;;  %v1757_v52 = vpop.permute.xlu0 %1756  ;;  %454 = vmatpush.msra.mxu3 %v1753_v48 }
 0x329   :  { %v1759_v53 = vunpack.i.h.bf16 %v1757_v52  ;;  %v1758_v54 = vunpack.i.l.bf16 %v1757_v52  ;;  %v356_v55 = vsel %vm304_vm4, %v2157_v49, 0.0  ;;  %v1839_v56 = vpop.eup %1838 }
 0x32a   :  { %357 = vadd.xlane.f32.xlu2 %v356_v55  ;;  %455 = vmatpush.msra.mxu3 %v1754_v51  ;;  %v374_v59 = vsel %vm304_vm4, %v1839_v56, 0.0  ;;  %v1841_v62 = vpop.eup %1840  ;;  %v2207_v55 = vld [vmem:[%s2701_s8] sm:$0xff] }
 0x32b   :  { %489 = vmatpush.msra.mxu0 %v1758_v54  ;;  %524 = vmatpush.msra.mxu1 %v1759_v53  ;;  %v353_v63 = vsel %vm304_vm4, %v1841_v62, 0.0 }
 0x32c   :  { %1766 = vrot.lane.b32.xlu0 %v1765_v57, %s1912_s2 }
 0x32d   :  { %v1762_v58 = vpop.permute.xlu2 %1761 }
 0x32e   :  { %v1764_v60 = vunpack.i.h.bf16 %v1762_v58  ;;  %v1763_v61 = vunpack.i.l.bf16 %v1762_v58  ;;  %375 = vadd.xlane.f32.xlu1 %v374_v59 }
 0x330   :  { %490 = vmatpush.msra.mxu0 %v1763_v61  ;;  %525 = vmatpush.msra.mxu1 %v1764_v60 }
 0x336   :  { %354 = vadd.xlane.f32.xlu1 %v353_v63 }
 0x383   :  { %v361_v0 = vpop.xlane.xlu0 %360 }
 0x384   :  { %1842 = vrcp.f32 %v361_v0 }
 0x389   :  { %v367_v18 = vpop.xlane.xlu1 %366 }
 0x38a   :  { %v1843_v20 = vpop.eup %1842  ;;  %1844 = vrcp.f32 %v367_v18 }
 0x38b   :  { %v387_v1 = vmul.f32 %v1843_v20, %v2142_v23  ;;  %v364_v2 = vpop.xlane.xlu0 %363 }
 0x38c   :  { %1846 = vrcp.f32 %v364_v2  ;;  %v1916_v2 = vmov 32.0  }
 0x38d   :  { %1671 = vmatmul.msk.f32.vlgmr.msra.gmra.mxu3 %vm304_vm4, %v387_v1 }
 0x390   :  { %v1845_v3 = vpop.eup %1844 }
 0x391   :  { %v389_v4 = vmul.f32 %v1845_v3, %v2146_v26  ;;  %v373_v5 = vpop.xlane.xlu1 %372 }
 0x392   :  { %v1847_v6 = vpop.eup %1846  ;;  %1848 = vrcp.f32 %v373_v5 }
 0x393   :  { %1673 = vmatmul.msk.f32.vlgmr.msra.gmra.mxu0 %vm304_vm4, %v389_v4  ;;  %v388_v7 = vmul.f32 %v1847_v6, %v2150_v29 }
 0x395   :  { %1672 = vmatmul.msk.f32.gmra.mxu3 %vm304_vm4, %v388_v7 }
 0x398   :  { %v1849_v8 = vpop.eup %1848 }
 0x399   :  { %v391_v9 = vmul.f32 %v1849_v8, %v1833_v34  ;;  %v370_v10 = vpop.xlane.xlu1 %369  ;;  %v663_v8 = vld [vmem:[%s2703_s9 + $0x10] sm:$0xff] }
 0x39a   :  { %1850 = vrcp.f32 %v370_v10  ;;  %v662_v10 = vld [vmem:[%s2703_s9 + $0x8] sm:$0xff] }
 0x39b   :  { %1675 = vmatmul.msk.f32.vlgmr.msra.gmra.mxu1 %vm304_vm4, %v391_v9 }
 0x39d   :  { %v358_v21 = vpop.xlane.xlu2 %357 }
 0x39e   :  { %v1767_v11 = vpop.permute.xlu0 %1766 }
 0x39f   :  { %v1768_v13 = vunpack.i.l.bf16 %v1767_v11  ;;  %v1769_v17 = vunpack.i.h.bf16 %v1767_v11 }
 0x3a0   :  { %v1851_v14 = vpop.eup %1850 }
 0x3a1   :  { %419 = vmatpush.msrb.mxu2 %v1768_v13  ;;  %v376_v16 = vpop.xlane.xlu1 %375  ;;  %v390_v19 = vmul.f32 %v1851_v14, %v1835_v43  ;;  %v661_v13 = vld [vmem:[%s2703_s9] sm:$0xff] }
 0x3a2   :  { %1852 = vrcp.f32 %v376_v16 }
 0x3a3   :  { %420 = vmatpush.msrb.mxu2 %v1769_v17  ;;  %1674 = vmatmul.msk.f32.gmra.mxu0 %vm304_vm4, %v390_v19 }
 0x3a5   :  { %587 = vmatpush.msra.mxu2 %v567_v35  ;;  %v655_v35 = vperm.slane %v2207_v55, 1 }
 0x3a7   :  { %588 = vmatpush.msra.mxu2 %v566_v36 }
 0x3a8   :  { %v1853_v23 = vpop.eup %1852 }
 0x3a9   :  { %v355_v24 = vpop.xlane.xlu1 %354  ;;  %v392_v25 = vmul.f32 %v1853_v23, %v1839_v56  ;;  %589 = vmatpush.msra.mxu2 %v565_v37  ;;  %v568_v56 = vperm.slane %v2207_v55, 0 }
 0x3aa   :  { %1854 = vrcp.f32 %v355_v24 }
 0x3ab   :  { %1676 = vmatmul.msk.f32.gmra.mxu1 %vm304_vm4, %v392_v25  ;;  %1856 = vrcp.f32 %v358_v21  ;;  %590 = vmatpush.msra.mxu2 %v564_v39  ;;  %v705_v39 = vld [vmem:[%s2704_s11 + $0x28] sm:$0xff] }
 0x3ac   :  { %1858 = vrcp.f32 %v1916_v2 }
 0x3b0   :  { %v1855_v22 = vpop.eup %1854 }
 0x3b1   :  { %v385_v26 = vmul.f32 %v1855_v22, %v1841_v62  ;;  %v1857_v27 = vpop.eup %1856 }
 0x3b2   :  { %v386_v28 = vmul.f32 %v1857_v27, %v2157_v49  ;;  %v1859_v3 = vpop.eup %1858 }
 0x3b3   :  { %1669 = vmatmul.msk.f32.vlgmr.msrb.gmra.mxu2 %vm304_vm4, %v385_v26  ;;  %v607_v4 = vmul.f32 32.0, %v1859_v3  ;;  %vm611_vm6 = vweird.f32 %v1859_v3 }
 0x3b5   :  { %v608_v5 = vsub.f32 1.0, %v607_v4 }
 0x3b7   :  { %v609_v6 = vmul.f32 %v1859_v3, %v608_v5  ;;  %v708_v5 = vperm.slane %v2207_v55, 3 }
 0x3b9   :  { %v610_v7 = vadd.f32 %v1859_v3, %v609_v6 }
 0x3bb   :  { %1670 = vmatmul.msk.f32.gmra.mxu2 %vm304_vm4, %v386_v28  ;;  %v2232_v9 = vsel %vm611_vm6, %v1859_v3, %v610_v7 }
 0x410   :  { %v457_v29 = vpop.f32.mrf.mxu3  ;;  %v492_v30 = vpop.f32.mrf.mxu0 }
 0x411   :  { %543 = vrot.lane.b32.xlu0 %v492_v30, %s1913_s23  ;;  %535 = vrot.lane.b32.xlu1 %v457_v29, %s1914_s3  ;;  %v707_v30 = vld [vmem:[%s2704_s11 + $0x38] sm:$0xff] }
 0x412   :  { %724 = vmatpush.msrb.mxu0 %v707_v30 }
 0x418   :  { %v527_v31 = vpop.f32.mrf.mxu1  ;;  %v460_v32 = vpop.f32.mrf.mxu3 }
 0x419   :  { %551 = vrot.lane.b32.xlu0 %v527_v31, %s1915_s24  ;;  %v706_v31 = vld [vmem:[%s2704_s11 + $0x30] sm:$0xff] }
 0x41a   :  { %725 = vmatpush.msrb.mxu0 %v706_v31 }
 0x41c   :  { %726 = vmatpush.msrb.mxu0 %v705_v39 }
 0x420   :  { %v495_v33 = vpop.f32.mrf.mxu0 }
 0x421   :  { %545 = vrot.lane.b32.xlu1 %v495_v33, %s1913_s23  ;;  %537 = vrot.lane.b32.xlu0 %v460_v32, %s1914_s3 }
 0x428   :  { %v530_v34 = vpop.f32.mrf.mxu1 }
 0x429   :  { %553 = vrot.lane.b32.xlu0 %v530_v34, %s1915_s24 }
 0x436   :  { %v422_v42 = vpop.f32.mrf.mxu2 }
 0x43e   :  { %v425_v49 = vpop.f32.mrf.mxu2 }
 0x483   :  { %v544_v40 = vpop.permute.xlu0 %543  ;;  %v536_v41 = vpop.permute.xlu1 %535 }
 0x484   :  { %v557_v43 = vsel %vm151_vm3, %v422_v42, %v536_v41 }
 0x485   :  { %v559_v45 = vsel %vm304_vm4, %v557_v43, %v544_v40  ;;  %v658_v43 = vperm.slane %v2207_v55, 2 }
 0x48b   :  { %v552_v44 = vpop.permute.xlu0 %551 }
 0x48c   :  { %v562_v46 = vsel %vm561_vm5, %v559_v45, %v552_v44  ;;  %v704_v44 = vld [vmem:[%s2704_s11 + $0x20] sm:$0xff] }
 0x48d   :  { %1677 = vmatmul.msk.f32.vlgmr.msra.gmra.mxu2 %vm103_vm2, %v562_v46  ;;  %727 = vmatpush.msrb.mxu0 %v704_v44 }
 0x493   :  { %v538_v48 = vpop.permute.xlu0 %537  ;;  %v546_v50 = vpop.permute.xlu1 %545 }
 0x494   :  { %v558_v51 = vsel %vm151_vm3, %v425_v49, %v538_v48  ;;  %v703_v48 = vld [vmem:[%s2704_s11 + $0x18] sm:$0xff] }
 0x495   :  { %v560_v53 = vsel %vm304_vm4, %v558_v51, %v546_v50  ;;  %728 = vmatpush.msrb.mxu0 %v703_v48 }
 0x49b   :  { %v554_v52 = vpop.permute.xlu0 %553 }
 0x49c   :  { %v563_v54 = vsel %vm561_vm5, %v560_v53, %v554_v52 }
 0x49d   :  { %1678 = vmatmul.msk.f32.gmra.mxu2 %vm103_vm2, %v563_v54 }
 0x510   :  { %v592_v57 = vpop.f32.mrf.mxu2 }
 0x511   :  { %v593_v58 = vadd.f32 %v592_v57, %v568_v56 }
 0x513   :  { %v2211_v59 = vadd.f32 %v593_v58, %v2023_v12 }
 0x515   :  { %v600_v60 = vsel %vm103_vm2, %v2211_v59, 0.0  ;;  %v615_v61 = vmul.f32 %v2211_v59, %v2211_v59 }
 0x516   :  { %601 = vadd.xlane.f32.xlu1 %v600_v60 }
 0x517   :  { %v617_v62 = vsel %vm103_vm2, %v615_v61, 0.0 }
 0x518   :  { %618 = vadd.xlane.f32.xlu0 %v617_v62  ;;  %v702_v62 = vld [vmem:[%s2704_s11 + $0x10] sm:$0xff] }
 0x519   :  { %729 = vmatpush.msrb.mxu0 %v702_v62 }
 0x520   :  { %v595_v63 = vpop.f32.mrf.mxu2 }
 0x521   :  { %v596_v0 = vadd.f32 %v595_v63, %v568_v56  ;;  %v701_v63 = vld [vmem:[%s2704_s11 + $0x8] sm:$0xff] }
 0x522   :  { %730 = vmatpush.msrb.mxu0 %v701_v63 }
 0x523   :  { %v2219_v18 = vadd.f32 %v596_v0, %v2027_v15  ;;  %v664_v15 = vld [vmem:[%s2703_s9 + $0x18] sm:$0xff]  ;;  %v700_v0 = vld [vmem:[%s2704_s11] sm:$0xff] }
 0x524   :  { %687 = vmatpush.msrb.mxu3 %v664_v15  ;;  %731 = vmatpush.msrb.mxu0 %v700_v0 }
 0x525   :  { %v603_v20 = vsel %vm103_vm2, %v2219_v18, 0.0  ;;  %v616_v12 = vmul.f32 %v2219_v18, %v2219_v18 }
 0x526   :  { %604 = vadd.xlane.f32.xlu2 %v603_v20  ;;  %688 = vmatpush.msrb.mxu3 %v663_v8 }
 0x527   :  { %v620_v1 = vsel %vm103_vm2, %v616_v12, 0.0 }
 0x528   :  { %689 = vmatpush.msrb.mxu3 %v662_v10 }
 0x52a   :  { %690 = vmatpush.msrb.mxu3 %v661_v13 }
 0x52e   :  { %621 = vadd.xlane.f32.xlu2 %v620_v1 }
 0x589   :  { %v602_v11 = vpop.xlane.xlu1 %601 }
 0x58a   :  { %v613_v14 = vmul.f32 %v2232_v9, %v602_v11 }
 0x58b   :  { %v619_v16 = vpop.xlane.xlu0 %618 }
 0x58c   :  { %v627_v17 = vmul.f32 %v613_v14, %v613_v14  ;;  %v623_v19 = vmul.f32 %v619_v16, %v2232_v9  ;;  %v625_v34 = vsub.f32 %v2211_v59, %v613_v14 }
 0x58e   :  { %v629_v23 = vsub.f32 %v623_v19, %v627_v17 }
 0x590   :  { %v631_v24 = vadd.f32 1e-05, %v629_v23 }
 0x592   :  { %1860 = vrsqrt.f32 %v631_v24  ;;  %vm639_vm8 = vweird.f32 %v631_v24 }
 0x598   :  { %v1861_v25 = vpop.eup %1860 }
 0x599   :  { %v634_v21 = vmul.f32 %v1861_v25, %v631_v24  ;;  %v605_v22 = vpop.xlane.xlu2 %604  ;;  %vm640_vm7 = vweird.f32 %v1861_v25 }
 0x59a   :  { %v614_v28 = vmul.f32 %v2232_v9, %v605_v22  ;;  %vm641_vm9 = vmor %vm639_vm8, %vm640_vm7  ;;  %v1685_v22 = vld [vmem:[%s2695_s5 + $0x28] sm:$0xff] }
 0x59b   :  { %v635_v26 = vmul.f32 %v1861_v25, %v634_v21  ;;  %v1686_v21 = vld [vmem:[%s2695_s5 + $0x30] sm:$0xff] }
 0x59c   :  { %v628_v36 = vmul.f32 %v614_v28, %v614_v28  ;;  %v626_v57 = vsub.f32 %v2219_v18, %v614_v28  ;;  %v1822_v18 = vld [vmem:[%s2702_s10] ss:$0 sm:$0xff] }
 0x59d   :  { %v636_v27 = vmul.f32 0.5, %v635_v26 }
 0x59f   :  { %v637_v29 = vsub.f32 1.5, %v636_v27  ;;  %v1684_v27 = vld [vmem:[%s2695_s5 + $0x20] sm:$0xff] }
 0x5a1   :  { %v638_v32 = vmul.f32 %v1861_v25, %v637_v29  ;;  %v622_v33 = vpop.xlane.xlu2 %621 }
 0x5a2   :  { %v624_v37 = vmul.f32 %v622_v33, %v2232_v9 }
 0x5a3   :  { %v642_v40 = vsel %vm641_vm9, %v1861_v25, %v638_v32  ;;  %v1687_v25 = vld [vmem:[%s2695_s5 + $0x38] sm:$0xff] }
 0x5a4   :  { %v653_v41 = vmul.f32 %v642_v40, %v625_v34  ;;  %v630_v42 = vsub.f32 %v624_v37, %v628_v36  ;;  %825 = vmatpush.msrb.mxu1 %v1687_v25 }
 0x5a6   :  { %v656_v45 = vmul.f32 %v655_v35, %v653_v41  ;;  %v632_v46 = vadd.f32 1e-05, %v630_v42  ;;  %826 = vmatpush.msrb.mxu1 %v1686_v21 }
 0x5a8   :  { %1862 = vrsqrt.f32 %v632_v46  ;;  %v659_v49 = vadd.f32 %v658_v43, %v656_v45  ;;  %vm649_vm11 = vweird.f32 %v632_v46  ;;  %827 = vmatpush.msrb.mxu1 %v1685_v22 }
 0x5aa   :  { %1679 = vmatmul.msk.f32.vlgmr.msrb.gmra.mxu3 %vm103_vm2, %v659_v49  ;;  %828 = vmatpush.msrb.mxu1 %v1684_v27 }
 0x5ae   :  { %v1863_v50 = vpop.eup %1862 }
 0x5af   :  { %v644_v51 = vmul.f32 %v1863_v50, %v632_v46  ;;  %vm650_vm10 = vweird.f32 %v1863_v50 }
 0x5b0   :  { %vm651_vm12 = vmor %vm649_vm11, %vm650_vm10 }
 0x5b1   :  { %v645_v52 = vmul.f32 %v1863_v50, %v644_v51 }
 0x5b3   :  { %v646_v53 = vmul.f32 0.5, %v645_v52  ;;  %v792_v52 = vperm.slane %v2207_v55, 5 }
 0x5b5   :  { %v647_v54 = vsub.f32 1.5, %v646_v53 }
 0x5b7   :  { %v648_v56 = vmul.f32 %v1863_v50, %v647_v54 }
 0x5b9   :  { %v652_v58 = vsel %vm651_vm12, %v1863_v50, %v648_v56 }
 0x5ba   :  { %v654_v59 = vmul.f32 %v652_v58, %v626_v57 }
 0x5bc   :  { %v657_v60 = vmul.f32 %v655_v35, %v654_v59 }
 0x5be   :  { %v660_v61 = vadd.f32 %v658_v43, %v657_v60 }
 0x5c0   :  { %1680 = vmatmul.msk.f32.gmra.mxu3 %vm103_vm2, %v660_v61 }
 0x62d   :  { %v692_v20 = vpop.f32.mrf.mxu3 }
 0x62e   :  { %v693_v12 = vadd.f32 %v1822_v18, %v692_v20  ;;  %v1823_v20 = vld [vmem:[%s2697_s6 + $0x1] ss:$0 sm:$0xff] }
 0x630   :  { %v698_v1 = vmax.f32 %v693_v12, 0.0 }
 0x632   :  { %1681 = vmatmul.msk.f32.vlgmr.msrb.gmra.mxu0 %vm709_vm13, %v698_v1 }
 0x643   :  { %v695_v2 = vpop.f32.mrf.mxu3 }
 0x644   :  { %v696_v3 = vadd.f32 %v1822_v18, %v695_v2 }
 0x646   :  { %v699_v4 = vmax.f32 %v696_v3, 0.0 }
 0x648   :  { %1682 = vmatmul.msk.f32.gmra.mxu0 %vm709_vm13, %v699_v4 }
 0x6af   :  { %v733_v6 = vpop.f32.mrf.mxu0 }
 0x6b0   :  { %v734_v7 = vadd.f32 %v733_v6, %v708_v5 }
 0x6b2   :  { %v739_v15 = vadd.f32 %v734_v7, %v659_v49  ;;  %v789_v49 = vperm.slane %v2207_v55, 4 }
 0x6b4   :  { %v741_v8 = vsel %vm103_vm2, %v739_v15, 0.0  ;;  %v749_v10 = vmul.f32 %v739_v15, %v739_v15 }
 0x6b5   :  { %742 = vadd.xlane.f32.xlu2 %v741_v8 }
 0x6b6   :  { %v751_v11 = vsel %vm103_vm2, %v749_v10, 0.0 }
 0x6bd   :  { %752 = vadd.xlane.f32.xlu2 %v751_v11 }
 0x6c5   :  { %v736_v13 = vpop.f32.mrf.mxu0 }
 0x6c6   :  { %v737_v14 = vadd.f32 %v736_v13, %v708_v5 }
 0x6c8   :  { %v740_v16 = vadd.f32 %v737_v14, %v660_v61 }
 0x6ca   :  { %v744_v17 = vsel %vm103_vm2, %v740_v16, 0.0  ;;  %v750_v19 = vmul.f32 %v740_v16, %v740_v16 }
 0x6cb   :  { %745 = vadd.xlane.f32.xlu2 %v744_v17 }
 0x6cc   :  { %v754_v23 = vsel %vm103_vm2, %v750_v19, 0.0 }
 0x6cd   :  { %755 = vadd.xlane.f32.xlu1 %v754_v23 }
 0x728   :  { %v743_v24 = vpop.xlane.xlu2 %742 }
 0x729   :  { %v747_v26 = vmul.f32 %v743_v24, %v2232_v9 }
 0x72b   :  { %v761_v29 = vmul.f32 %v747_v26, %v747_v26  ;;  %v759_v48 = vsub.f32 %v739_v15, %v747_v26 }
 0x730   :  { %v753_v28 = vpop.xlane.xlu2 %752 }
 0x731   :  { %v757_v30 = vmul.f32 %v753_v28, %v2232_v9 }
 0x733   :  { %v763_v31 = vsub.f32 %v757_v30, %v761_v29 }
 0x735   :  { %v765_v32 = vadd.f32 1e-05, %v763_v31 }
 0x737   :  { %1864 = vrsqrt.f32 %v765_v32  ;;  %vm773_vm15 = vweird.f32 %v765_v32 }
 0x73d   :  { %v1865_v33 = vpop.eup %1864 }
 0x73e   :  { %v768_v34 = vmul.f32 %v1865_v33, %v765_v32  ;;  %v746_v35 = vpop.xlane.xlu2 %745  ;;  %vm774_vm14 = vweird.f32 %v1865_v33 }
 0x73f   :  { %v748_v36 = vmul.f32 %v746_v35, %v2232_v9  ;;  %vm775_vm0 = vmor %vm773_vm15, %vm774_vm14 }
 0x740   :  { %v769_v37 = vmul.f32 %v1865_v33, %v768_v34  ;;  %v756_v39 = vpop.xlane.xlu1 %755 }
 0x741   :  { %v762_v40 = vmul.f32 %v748_v36, %v748_v36  ;;  %v758_v41 = vmul.f32 %v756_v39, %v2232_v9  ;;  %v760_v62 = vsub.f32 %v740_v16, %v748_v36 }
 0x742   :  { %v770_v42 = vmul.f32 0.5, %v769_v37 }
 0x743   :  { %v764_v43 = vsub.f32 %v758_v41, %v762_v40 }
 0x744   :  { %v771_v44 = vsub.f32 1.5, %v770_v42 }
 0x745   :  { %v766_v45 = vadd.f32 1e-05, %v764_v43 }
 0x746   :  { %v772_v46 = vmul.f32 %v1865_v33, %v771_v44 }
 0x747   :  { %1866 = vrsqrt.f32 %v766_v45  ;;  %vm783_vm6 = vweird.f32 %v766_v45 }
 0x748   :  { %v776_v50 = vsel %vm775_vm0, %v1865_v33, %v772_v46 }
 0x749   :  { %v787_v51 = vmul.f32 %v776_v50, %v759_v48 }
 0x74b   :  { %v790_v53 = vmul.f32 %v789_v49, %v787_v51 }
 0x74d   :  { %v1867_v54 = vpop.eup %1866  ;;  %v2302_v56 = vadd.f32 %v792_v52, %v790_v53 }
 0x74e   :  { %v778_v57 = vmul.f32 %v1867_v54, %v766_v45  ;;  %vm784_vm1 = vweird.f32 %v1867_v54 }
 0x74f   :  { %1689 = vmatmul.msk.f32.vlgmr.msrb.gmra.mxu1 %vm103_vm2, %v2302_v56  ;;  %vm785_vm7 = vmor %vm783_vm6, %vm784_vm1  ;;  %vm1520_vm6 = vcmask 785408  }
 0x750   :  { %v779_v58 = vmul.f32 %v1867_v54, %v778_v57 }
 0x752   :  { %v780_v59 = vmul.f32 0.5, %v779_v58 }
 0x754   :  { %v781_v60 = vsub.f32 1.5, %v780_v59 }
 0x756   :  { %v782_v61 = vmul.f32 %v1867_v54, %v781_v60 }
 0x758   :  { %v786_v63 = vsel %vm785_vm7, %v1867_v54, %v782_v61  ;;  %vm1564_vm7 = vcmask 1040384  }
 0x759   :  { %v788_v0 = vmul.f32 %v786_v63, %v760_v62 }
 0x75b   :  { %v791_v18 = vmul.f32 %v789_v49, %v788_v0 }
 0x75d   :  { %v2306_v55 = vadd.f32 %v792_v52, %v791_v18 }
 0x75f   :  { %1690 = vmatmul.msk.f32.gmra.mxu1 %vm103_vm2, %v2306_v55 }
 0x7cc   :  { %v830_v12 = vpop.f32.mrf.mxu1 }
 0x7cd   :  { %v2313_v1 = vadd.f32 %v1823_v20, %v830_v12 }
 0x7cf   :  { %838 = vrot.lane.b32.xlu2 %v2313_v1, %s1909_s16 }
 0x7d7   :  { %842 = vrot.lane.b32.xlu2 %v2313_v1, %s1908_s1 }
 0x7dc   :  { %v833_v2 = vpop.f32.mrf.mxu1 }
 0x7dd   :  { %v2319_v3 = vadd.f32 %v1823_v20, %v833_v2 }
 0x7df   :  { %844 = vrot.lane.b32.xlu1 %v2319_v3, %s1908_s1  ;;  %840 = vrot.lane.b32.xlu0 %v2319_v3, %s1909_s16  ;;  %v1785_v59 = vpack.i.bf16 %v2313_v1, %v2319_v3 }
 0x7e7   :  { %848 = vrot.lane.b32.xlu0 %v2319_v3, %s1910_s17 }
 0x7ef   :  { %846 = vrot.lane.b32.xlu0 %v2313_v1, %s1910_s17 }
 0x829   :  { %v2329_v4 = vpop.permute.xlu2 %838 }
 0x82a   :  { %885 = vrot.lane.b32.xlu2 %v2329_v4, %s1911_s18 }
 0x831   :  { %v2333_v5 = vpop.permute.xlu2 %842 }
 0x832   :  { %920 = vrot.lane.b32.xlu2 %v2333_v5, %s1911_s18 }
 0x83a   :  { %850 = vrot.lane.b32.xlu2 %v2313_v1, %s1911_s18 }
 0x851   :  { %v2339_v6 = vpop.permute.xlu1 %844  ;;  %v2341_v7 = vpop.permute.xlu0 %840 }
 0x852   :  { %922 = vrot.lane.b32.xlu0 %v2339_v6, %s1911_s18  ;;  %887 = vrot.lane.b32.xlu1 %v2341_v7, %s1911_s18  ;;  %v1770_v58 = vpack.i.bf16 %v2329_v4, %v2341_v7 }
 0x859   :  { %v2347_v15 = vpop.permute.xlu0 %848 }
 0x85a   :  { %957 = vrot.lane.b32.xlu1 %v2347_v15, %s1911_s18 }
 0x861   :  { %v2351_v8 = vpop.permute.xlu0 %846 }
 0x862   :  { %852 = vrot.lane.b32.xlu1 %v2319_v3, %s1911_s18  ;;  %955 = vrot.lane.b32.xlu0 %v2351_v8, %s1911_s18 }
 0x884   :  { %v886_v10 = vpop.permute.xlu2 %885 }
 0x88c   :  { %v921_v14 = vpop.permute.xlu2 %920 }
 0x894   :  { %v851_v23 = vpop.permute.xlu2 %850 }
 0x8c4   :  { %v888_v11 = vpop.permute.xlu1 %887  ;;  %v923_v13 = vpop.permute.xlu0 %922 }
 0x8c5   :  { %1695 = vmatpush.xpose.msk.msra.mxu3 %vm151_vm3, %v888_v11  ;;  %1699 = vmatpush.xpose.msk.msra.mxu0 %vm151_vm3, %v923_v13 }
 0x8c9   :  { %1696 = vmatpush.xpose.msk.msra.mxu3 %vm151_vm3, %v886_v10  ;;  %1700 = vmatpush.xpose.msk.msra.mxu0 %vm151_vm3, %v921_v14 }
 0x8cc   :  { %v958_v16 = vpop.permute.xlu1 %957  ;;  %1697 = vmatmul.msk.f32.vlgmr.msra.gmra.mxu3 %vm151_vm3, %v2329_v4  ;;  %1701 = vmatmul.msk.f32.vlgmr.msra.gmra.mxu0 %vm151_vm3, %v2333_v5 }
 0x8cd   :  { %1703 = vmatpush.xpose.msk.msra.mxu1 %vm151_vm3, %v958_v16 }
 0x8d4   :  { %v853_v17 = vpop.permute.xlu1 %852  ;;  %v956_v19 = vpop.permute.xlu0 %955  ;;  %1698 = vmatmul.msk.f32.gmra.mxu3 %vm151_vm3, %v2341_v7  ;;  %1702 = vmatmul.msk.f32.gmra.mxu0 %vm151_vm3, %v2339_v6 }
 0x8d5   :  { %1691 = vmatpush.xpose.msk.msrb.mxu2 %vm151_vm3, %v853_v17  ;;  %1704 = vmatpush.xpose.msk.msra.mxu1 %vm151_vm3, %v956_v19 }
 0x8d8   :  { %1705 = vmatmul.msk.f32.vlgmr.msra.gmra.mxu1 %vm151_vm3, %v2351_v8 }
 0x8d9   :  { %1692 = vmatpush.xpose.msk.msrb.mxu2 %vm151_vm3, %v851_v23 }
 0x8dc   :  { %1693 = vmatmul.msk.f32.vlgmr.msrb.gmra.mxu2 %vm151_vm3, %v2313_v1 }
 0x8e0   :  { %1706 = vmatmul.msk.f32.gmra.mxu1 %vm151_vm3, %v2347_v15 }
 0x8e4   :  { %1694 = vmatmul.msk.f32.gmra.mxu2 %vm151_vm3, %v2319_v3 }
 0x949   :  { %v949_v24 = vpop.f32.mrf.mxu0 }
 0x94a   :  { %v994_v25 = vmul.f32 0.35355338, %v949_v24 }
 0x94c   :  { %v1002_v21 = vadd.f32 %v994_v25, %v2107_v38 }
 0x94e   :  { %v1018_v22 = vsel %vm304_vm4, %v1002_v21, -inf }
 0x94f   :  { %v914_v26 = vpop.f32.mrf.mxu3  ;;  %1019 = vmax.xlane.f32.xlu1 %v1018_v22 }
 0x950   :  { %v992_v27 = vmul.f32 0.35355338, %v914_v26 }
 0x951   :  { %v952_v28 = vpop.f32.mrf.mxu0 }
 0x952   :  { %v995_v29 = vmul.f32 0.35355338, %v952_v28  ;;  %v1000_v30 = vadd.f32 %v992_v27, %v2107_v38 }
 0x954   :  { %v1012_v31 = vsel %vm304_vm4, %v1000_v30, -inf  ;;  %v1003_v32 = vadd.f32 %v995_v29, %v2115_v47 }
 0x955   :  { %v984_v33 = vpop.f32.mrf.mxu1  ;;  %1013 = vmax.xlane.f32.xlu0 %v1012_v31 }
 0x956   :  { %v996_v34 = vmul.f32 0.35355338, %v984_v33  ;;  %v1021_v35 = vsel %vm304_vm4, %v1003_v32, -inf  ;;  %v1775_v33 = vpack.i.bf16 %v2347_v15, %v2339_v6 }
 0x957   :  { %v917_v36 = vpop.f32.mrf.mxu3  ;;  %1022 = vmax.xlane.f32.xlu1 %v1021_v35 }
 0x958   :  { %v993_v37 = vmul.f32 0.35355338, %v917_v36  ;;  %v1004_v39 = vadd.f32 %v996_v34, %v2107_v38 }
 0x95a   :  { %v1001_v40 = vadd.f32 %v993_v37, %v2115_v47  ;;  %v1024_v41 = vsel %vm304_vm4, %v1004_v39, -inf }
 0x95c   :  { %v1015_v42 = vsel %vm304_vm4, %v1001_v40, -inf }
 0x95d   :  { %v987_v43 = vpop.f32.mrf.mxu1  ;;  %1025 = vmax.xlane.f32.xlu0 %v1024_v41  ;;  %1016 = vmax.xlane.f32.xlu2 %v1015_v42 }
 0x95e   :  { %v997_v44 = vmul.f32 0.35355338, %v987_v43 }
 0x95f   :  { %v879_v45 = vpop.f32.mrf.mxu2 }
 0x960   :  { %v990_v46 = vmul.f32 0.35355338, %v879_v45  ;;  %v1005_v48 = vadd.f32 %v997_v44, %v2115_v47 }
 0x962   :  { %v998_v49 = vadd.f32 %v990_v46, %v2107_v38  ;;  %v1027_v50 = vsel %vm304_vm4, %v1005_v48, -inf  ;;  %v1780_v38 = vpack.i.bf16 %v2351_v8, %v2333_v5 }
 0x964   :  { %v1006_v51 = vsel %vm304_vm4, %v998_v49, -inf }
 0x965   :  { %1028 = vmax.xlane.f32.xlu2 %v1027_v50  ;;  %1007 = vmax.xlane.f32.xlu0 %v1006_v51 }
 0x967   :  { %v882_v52 = vpop.f32.mrf.mxu2 }
 0x968   :  { %v991_v53 = vmul.f32 0.35355338, %v882_v52 }
 0x96a   :  { %v2396_v54 = vadd.f32 %v991_v53, %v2115_v47 }
 0x96c   :  { %v1009_v57 = vsel %vm304_vm4, %v2396_v54, -inf }
 0x96d   :  { %1010 = vmax.xlane.f32.xlu1 %v1009_v57 }
 0x986   :  { %1771 = vrot.lane.b32.xlu1 %v1770_v58, %s1912_s2 }
 0x98e   :  { %1781 = vrot.lane.b32.xlu1 %v1780_v38, %s1912_s2 }
 0x996   :  { %1786 = vrot.lane.b32.xlu1 %v1785_v59, %s1912_s2 }
 0x9c2   :  { %v1020_v47 = vpop.xlane.xlu1 %1019 }
 0x9c3   :  { %v1034_v60 = vsub.f32 %v1002_v21, %v1020_v47 }
 0x9c5   :  { %v1046_v61 = vmul.f32 1.442695, %v1034_v60 }
 0x9c7   :  { %1868 = vpow2.f32 %v1046_v61 }
 0x9c8   :  { %v1014_v62 = vpop.xlane.xlu0 %1013 }
 0x9c9   :  { %v1032_v63 = vsub.f32 %v1000_v30, %v1014_v62 }
 0x9ca   :  { %v1023_v12 = vpop.xlane.xlu1 %1022 }
 0x9cb   :  { %v1042_v0 = vmul.f32 1.442695, %v1032_v63  ;;  %v1035_v7 = vsub.f32 %v1003_v32, %v1023_v12 }
 0x9cd   :  { %v2409_v18 = vpop.eup %1868  ;;  %1870 = vpow2.f32 %v1042_v0  ;;  %v1048_v13 = vmul.f32 1.442695, %v1035_v7 }
 0x9ce   :  { %v1066_v20 = vsel %vm304_vm4, %v2409_v18, 0.0 }
 0x9cf   :  { %1067 = vadd.xlane.f32.xlu0 %v1066_v20 }
 0x9d0   :  { %v1026_v2 = vpop.xlane.xlu0 %1025  ;;  %v1017_v4 = vpop.xlane.xlu2 %1016 }
 0x9d1   :  { %v1036_v1 = vsub.f32 %v1004_v39, %v1026_v2  ;;  %v1033_v3 = vsub.f32 %v1001_v40, %v1017_v4 }
 0x9d3   :  { %v1871_v5 = vpop.eup %1870  ;;  %v1050_v8 = vmul.f32 1.442695, %v1036_v1  ;;  %v1044_v10 = vmul.f32 1.442695, %v1033_v3 }
 0x9d4   :  { %v1060_v11 = vsel %vm304_vm4, %v1871_v5, 0.0 }
 0x9d5   :  { %1872 = vpow2.f32 %v1050_v8  ;;  %1061 = vadd.xlane.f32.xlu2 %v1060_v11 }
 0x9d6   :  { %1874 = vpow2.f32 %v1044_v10 }
 0x9d7   :  { %1876 = vpow2.f32 %v1048_v13 }
 0x9d8   :  { %v1029_v14 = vpop.xlane.xlu2 %1028  ;;  %v1008_v21 = vpop.xlane.xlu0 %1007 }
 0x9d9   :  { %v1037_v17 = vsub.f32 %v1005_v48, %v1029_v14  ;;  %v1030_v26 = vsub.f32 %v998_v49, %v1008_v21 }
 0x9db   :  { %v2414_v16 = vpop.eup %1872  ;;  %v1052_v25 = vmul.f32 1.442695, %v1037_v17  ;;  %v1038_v28 = vmul.f32 1.442695, %v1030_v26 }
 0x9dc   :  { %v1875_v19 = vpop.eup %1874  ;;  %v1072_v23 = vsel %vm304_vm4, %v2414_v16, 0.0 }
 0x9dd   :  { %1073 = vadd.xlane.f32.xlu0 %v1072_v23  ;;  %v1063_v24 = vsel %vm304_vm4, %v1875_v19, 0.0  ;;  %v2419_v22 = vpop.eup %1876  ;;  %1878 = vpow2.f32 %v1052_v25  ;;  %v1717_v23 = vld [vmem:[%s2700_s7 + $0x30] sm:$0xff]  ;;  %v1715_v25 = vld [vmem:[%s2700_s7 + $0x20] sm:$0xff] }
 0x9de   :  { %1064 = vadd.xlane.f32.xlu2 %v1063_v24  ;;  %v1069_v27 = vsel %vm304_vm4, %v2419_v22, 0.0  ;;  %1880 = vpow2.f32 %v1038_v28  ;;  %v1716_v24 = vld [vmem:[%s2700_s7 + $0x28] sm:$0xff] }
 0x9e0   :  { %v1011_v31 = vpop.xlane.xlu1 %1010 }
 0x9e1   :  { %v1031_v43 = vsub.f32 %v2396_v54, %v1011_v31 }
 0x9e3   :  { %v2423_v29 = vpop.eup %1878  ;;  %v1040_v6 = vmul.f32 1.442695, %v1031_v43 }
 0x9e4   :  { %v1075_v30 = vsel %vm304_vm4, %v2423_v29, 0.0  ;;  %v2427_v32 = vpop.eup %1880 }
 0x9e5   :  { %1070 = vadd.xlane.f32.xlu0 %v1069_v27  ;;  %v1054_v34 = vsel %vm304_vm4, %v2427_v32, 0.0  ;;  %1882 = vpow2.f32 %v1040_v6 }
 0x9eb   :  { %v1883_v15 = vpop.eup %1882 }
 0x9ec   :  { %v1057_v44 = vsel %vm304_vm4, %v1883_v15, 0.0 }
 0x9ed   :  { %1076 = vadd.xlane.f32.xlu0 %v1075_v30 }
 0x9f5   :  { %1055 = vadd.xlane.f32.xlu0 %v1054_v34 }
 0x9f6   :  { %1776 = vrot.lane.b32.xlu2 %v1775_v33, %s1912_s2 }
 0x9f8   :  { %v1772_v35 = vpop.permute.xlu1 %1771 }
 0x9f9   :  { %v1773_v36 = vunpack.i.l.bf16 %v1772_v35  ;;  %v1774_v37 = vunpack.i.h.bf16 %v1772_v35 }
 0x9fb   :  { %1155 = vmatpush.msrb.mxu3 %v1773_v36 }
 0x9fd   :  { %1156 = vmatpush.msrb.mxu3 %v1774_v37 }
 0xa00   :  { %v1782_v39 = vpop.permute.xlu1 %1781 }
 0xa01   :  { %v1784_v60 = vunpack.i.h.bf16 %v1782_v39  ;;  %v1783_v61 = vunpack.i.l.bf16 %v1782_v39  ;;  %v2478_v39 = vld [vmem:[%s2701_s8 + $0x8] sm:$0xff] }
 0xa08   :  { %v1787_v40 = vpop.permute.xlu1 %1786 }
 0xa09   :  { %v1788_v41 = vunpack.i.l.bf16 %v1787_v40  ;;  %v1789_v42 = vunpack.i.h.bf16 %v1787_v40  ;;  %v1269_v40 = vperm.slane %v2478_v39, 0 }
 0xa0b   :  { %1120 = vmatpush.msra.mxu2 %v1788_v41 }
 0xa0d   :  { %1121 = vmatpush.msra.mxu2 %v1789_v42 }
 0xa1f   :  { %1058 = vadd.xlane.f32.xlu2 %v1057_v44 }
 0xa42   :  { %v1068_v45 = vpop.xlane.xlu0 %1067 }
 0xa48   :  { %v1062_v46 = vpop.xlane.xlu2 %1061 }
 0xa49   :  { %1884 = vrcp.f32 %v1062_v46 }
 0xa4f   :  { %v1885_v48 = vpop.eup %1884 }
 0xa50   :  { %v1088_v49 = vmul.f32 %v1885_v48, %v1871_v5  ;;  %v1074_v50 = vpop.xlane.xlu0 %1073 }
 0xa51   :  { %v1065_v51 = vpop.xlane.xlu2 %1064 }
 0xa52   :  { %1886 = vrcp.f32 %v1065_v51  ;;  %1709 = vmatmul.msk.f32.vlgmr.msrb.gmra.mxu3 %vm304_vm4, %v1088_v49  ;;  %v1724_v51 = vld [vmem:[%s2703_s9 + $0x38] sm:$0xff] }
 0xa53   :  { %1888 = vrcp.f32 %v1068_v45  ;;  %1383 = vmatpush.msra.mxu3 %v1724_v51 }
 0xa54   :  { %1890 = vrcp.f32 %v1074_v50 }
 0xa58   :  { %v1887_v52 = vpop.eup %1886  ;;  %v1071_v53 = vpop.xlane.xlu0 %1070 }
 0xa59   :  { %v1889_v54 = vpop.eup %1888  ;;  %v1777_v57 = vpop.permute.xlu2 %1776  ;;  %v1089_v58 = vmul.f32 %v1887_v52, %v1875_v19  ;;  %1892 = vrcp.f32 %v1071_v53  ;;  %v1718_v19 = vld [vmem:[%s2700_s7 + $0x38] sm:$0xff]  ;;  %v1722_v52 = vld [vmem:[%s2703_s9 + $0x28] sm:$0xff]  ;;  %v1721_v53 = vld [vmem:[%s2703_s9 + $0x20] sm:$0xff] }
 0xa5a   :  { %v1891_v38 = vpop.eup %1890  ;;  %v1779_v59 = vunpack.i.h.bf16 %v1777_v57  ;;  %v1778_v47 = vunpack.i.l.bf16 %v1777_v57  ;;  %v1090_v62 = vmul.f32 %v1889_v54, %v2409_v18  ;;  %1288 = vmatpush.msrb.mxu2 %v1718_v19  ;;  %v1732_v19 = vld [vmem:[%s2704_s11 + $0x60] sm:$0xff] }
 0xa5b   :  { %1710 = vmatmul.msk.f32.gmra.mxu3 %vm304_vm4, %v1089_v58  ;;  %v1092_v63 = vmul.f32 %v1891_v38, %v2414_v16 }
 0xa5c   :  { %1190 = vmatpush.msrb.mxu0 %v1778_v47  ;;  %1225 = vmatpush.msrb.mxu1 %v1779_v59 }
 0xa5d   :  { %1289 = vmatpush.msrb.mxu2 %v1717_v23 }
 0xa5e   :  { %1191 = vmatpush.msrb.mxu0 %v1783_v61  ;;  %1226 = vmatpush.msrb.mxu1 %v1784_v60 }
 0xa5f   :  { %1711 = vmatmul.msk.f32.vlgmr.msrb.gmra.mxu0 %vm304_vm4, %v1090_v62  ;;  %1713 = vmatmul.msk.f32.vlgmr.msrb.gmra.mxu1 %vm304_vm4, %v1092_v63  ;;  %v1893_v20 = vpop.eup %1892 }
 0xa60   :  { %v1077_v0 = vpop.xlane.xlu0 %1076  ;;  %v1091_v12 = vmul.f32 %v1893_v20, %v2419_v22  ;;  %1290 = vmatpush.msrb.mxu2 %v1716_v24 }
 0xa61   :  { %1894 = vrcp.f32 %v1077_v0 }
 0xa62   :  { %1291 = vmatpush.msrb.mxu2 %v1715_v25  ;;  %v1731_v25 = vld [vmem:[%s2704_s11 + $0x58] sm:$0xff] }
 0xa67   :  { %v1895_v2 = vpop.eup %1894  ;;  %1712 = vmatmul.msk.f32.gmra.mxu0 %vm304_vm4, %v1091_v12 }
 0xa68   :  { %v1056_v4 = vpop.xlane.xlu0 %1055  ;;  %v1093_v1 = vmul.f32 %v1895_v2, %v2423_v29 }
 0xa69   :  { %1896 = vrcp.f32 %v1056_v4  ;;  %v1735_v4 = vld [vmem:[%s2704_s11 + $0x78] sm:$0xff] }
 0xa6a   :  { %1714 = vmatmul.msk.f32.gmra.mxu1 %vm304_vm4, %v1093_v1  ;;  %v1734_v1 = vld [vmem:[%s2704_s11 + $0x70] sm:$0xff]  ;;  %1420 = vmatpush.msra.mxu0 %v1735_v4 }
 0xa6c   :  { %1421 = vmatpush.msra.mxu0 %v1734_v1 }
 0xa6f   :  { %v1897_v18 = vpop.eup %1896 }
 0xa70   :  { %v1086_v3 = vmul.f32 %v1897_v18, %v2427_v32 }
 0xa72   :  { %1707 = vmatmul.msk.f32.vlgmr.msra.gmra.mxu2 %vm304_vm4, %v1086_v3 }
 0xa92   :  { %v1059_v5 = vpop.xlane.xlu2 %1058 }
 0xa93   :  { %1898 = vrcp.f32 %v1059_v5 }
 0xa99   :  { %v1899_v7 = vpop.eup %1898 }
 0xa9a   :  { %v1087_v8 = vmul.f32 %v1899_v7, %v1883_v15  ;;  %v1349_v7 = vperm.slane %v2478_v39, 1 }
 0xa9c   :  { %1708 = vmatmul.msk.f32.gmra.mxu2 %vm304_vm4, %v1087_v8 }
 0xad5   :  { %v1158_v10 = vpop.f32.mrf.mxu3 }
 0xad6   :  { %1236 = vrot.lane.b32.xlu0 %v1158_v10, %s1914_s3 }
 0xadc   :  { %v1193_v11 = vpop.f32.mrf.mxu0  ;;  %v1228_v13 = vpop.f32.mrf.mxu1 }
 0xadd   :  { %1244 = vrot.lane.b32.xlu1 %v1193_v11, %s1913_s23  ;;  %v1733_v11 = vld [vmem:[%s2704_s11 + $0x68] sm:$0xff] }
 0xade   :  { %v1161_v16 = vpop.f32.mrf.mxu3  ;;  %1422 = vmatpush.msra.mxu0 %v1733_v11 }
 0xae0   :  { %1423 = vmatpush.msra.mxu0 %v1732_v19 }
 0xae2   :  { %1424 = vmatpush.msra.mxu0 %v1731_v25 }
 0xae4   :  { %v1196_v14 = vpop.f32.mrf.mxu0 }
 0xae5   :  { %1252 = vrot.lane.b32.xlu1 %v1228_v13, %s1915_s24  ;;  %1246 = vrot.lane.b32.xlu0 %v1196_v14, %s1913_s23 }
 0xae7   :  { %v1231_v17 = vpop.f32.mrf.mxu1 }
 0xaed   :  { %1238 = vrot.lane.b32.xlu1 %v1161_v16, %s1914_s3 }
 0xaf5   :  { %1254 = vrot.lane.b32.xlu1 %v1231_v17, %s1915_s24  ;;  %v1123_v26 = vpop.f32.mrf.mxu2  ;;  %v1352_v17 = vperm.slane %v2478_v39, 2 }
 0xb1f   :  { %v1126_v32 = vpop.f32.mrf.mxu2 }
 0xb48   :  { %v1237_v22 = vpop.permute.xlu0 %1236 }
 0xb49   :  { %v1258_v27 = vsel %vm151_vm3, %v1123_v26, %v1237_v22 }
 0xb4f   :  { %v1245_v21 = vpop.permute.xlu1 %1244 }
 0xb50   :  { %v1260_v28 = vsel %vm304_vm4, %v1258_v27, %v1245_v21 }
 0xb57   :  { %v1253_v29 = vpop.permute.xlu1 %1252  ;;  %v1247_v34 = vpop.permute.xlu0 %1246 }
 0xb58   :  { %v1262_v30 = vsel %vm561_vm5, %v1260_v28, %v1253_v29 }
 0xb59   :  { %1719 = vmatmul.msk.f32.vlgmr.msrb.gmra.mxu2 %vm103_vm2, %v1262_v30 }
 0xb5f   :  { %v1239_v31 = vpop.permute.xlu1 %1238 }
 0xb60   :  { %v1259_v33 = vsel %vm151_vm3, %v1126_v32, %v1239_v31 }
 0xb61   :  { %v1261_v36 = vsel %vm304_vm4, %v1259_v33, %v1247_v34 }
 0xb67   :  { %v1255_v35 = vpop.permute.xlu1 %1254 }
 0xb68   :  { %v1263_v37 = vsel %vm561_vm5, %v1261_v36, %v1255_v35  ;;  %v1730_v36 = vld [vmem:[%s2704_s11 + $0x50] sm:$0xff] }
 0xb69   :  { %1720 = vmatmul.msk.f32.gmra.mxu2 %vm103_vm2, %v1263_v37  ;;  %1425 = vmatpush.msra.mxu0 %v1730_v36  ;;  %v1729_v37 = vld [vmem:[%s2704_s11 + $0x48] sm:$0xff] }
 0xb6b   :  { %1426 = vmatpush.msra.mxu0 %v1729_v37 }
 0xbdc   :  { %v1293_v41 = vpop.f32.mrf.mxu2 }
 0xbdd   :  { %v1294_v42 = vadd.f32 %v1293_v41, %v1269_v40  ;;  %v1824_v41 = vld [vmem:[%s2702_s10 + $0x1] ss:$0 sm:$0xff]  ;;  %s1917_s10 = smov 32  }
 0xbdf   :  { %v1299_v43 = vadd.f32 %v1294_v42, %v2302_v56 }
 0xbe1   :  { %v1301_v6 = vsel %vm103_vm2, %v1299_v43, 0.0  ;;  %v1309_v15 = vmul.f32 %v1299_v43, %v1299_v43 }
 0xbe2   :  { %1302 = vadd.xlane.f32.xlu0 %v1301_v6 }
 0xbe3   :  { %v1311_v44 = vsel %vm103_vm2, %v1309_v15, 0.0 }
 0xbe4   :  { %1312 = vadd.xlane.f32.xlu1 %v1311_v44 }
 0xbec   :  { %v1296_v45 = vpop.f32.mrf.mxu2 }
 0xbed   :  { %v1297_v46 = vadd.f32 %v1296_v45, %v1269_v40  ;;  %v1728_v40 = vld [vmem:[%s2704_s11 + $0x40] sm:$0xff] }
 0xbee   :  { %1427 = vmatpush.msra.mxu0 %v1728_v40 }
 0xbef   :  { %v2485_v48 = vadd.f32 %v1297_v46, %v2306_v55  ;;  %v1723_v55 = vld [vmem:[%s2703_s9 + $0x30] sm:$0xff]  ;;  %v1405_v46 = vperm.slane %v2478_v39, 3 }
 0xbf0   :  { %1384 = vmatpush.msra.mxu3 %v1723_v55 }
 0xbf1   :  { %v1304_v49 = vsel %vm103_vm2, %v2485_v48, 0.0  ;;  %v1310_v50 = vmul.f32 %v2485_v48, %v2485_v48 }
 0xbf2   :  { %1305 = vadd.xlane.f32.xlu2 %v1304_v49  ;;  %1385 = vmatpush.msra.mxu3 %v1722_v52 }
 0xbf3   :  { %v1314_v56 = vsel %vm103_vm2, %v1310_v50, 0.0 }
 0xbf4   :  { %1386 = vmatpush.msra.mxu3 %v1721_v53 }
 0xbfa   :  { %1315 = vadd.xlane.f32.xlu2 %v1314_v56 }
 0xc55   :  { %v1303_v54 = vpop.xlane.xlu0 %1302 }
 0xc56   :  { %v1307_v57 = vmul.f32 %v1303_v54, %v2232_v9 }
 0xc57   :  { %v1313_v58 = vpop.xlane.xlu1 %1312 }
 0xc58   :  { %v1321_v38 = vmul.f32 %v1307_v57, %v1307_v57  ;;  %v1317_v59 = vmul.f32 %v1313_v58, %v2232_v9  ;;  %v1319_v5 = vsub.f32 %v1299_v43, %v1307_v57 }
 0xc5a   :  { %v1323_v47 = vsub.f32 %v1317_v59, %v1321_v38 }
 0xc5c   :  { %v1325_v60 = vadd.f32 1e-05, %v1323_v47 }
 0xc5e   :  { %1900 = vrsqrt.f32 %v1325_v60  ;;  %vm1333_vm4 = vweird.f32 %v1325_v60 }
 0xc64   :  { %v1901_v61 = vpop.eup %1900 }
 0xc65   :  { %v1328_v62 = vmul.f32 %v1901_v61, %v1325_v60  ;;  %v1306_v63 = vpop.xlane.xlu2 %1305  ;;  %vm1334_vm3 = vweird.f32 %v1901_v61 }
 0xc66   :  { %v1308_v12 = vmul.f32 %v1306_v63, %v2232_v9  ;;  %vm1335_vm5 = vmor %vm1333_vm4, %vm1334_vm3 }
 0xc67   :  { %v1329_v0 = vmul.f32 %v1901_v61, %v1328_v62 }
 0xc68   :  { %v1322_v8 = vmul.f32 %v1308_v12, %v1308_v12  ;;  %v1320_v31 = vsub.f32 %v2485_v48, %v1308_v12 }
 0xc69   :  { %v1330_v20 = vmul.f32 0.5, %v1329_v0 }
 0xc6b   :  { %v1331_v2 = vsub.f32 1.5, %v1330_v20 }
 0xc6d   :  { %v1332_v18 = vmul.f32 %v1901_v61, %v1331_v2  ;;  %v1316_v3 = vpop.xlane.xlu2 %1315 }
 0xc6e   :  { %v1318_v10 = vmul.f32 %v1316_v3, %v2232_v9 }
 0xc6f   :  { %v1336_v13 = vsel %vm1335_vm5, %v1901_v61, %v1332_v18 }
 0xc70   :  { %v1347_v14 = vmul.f32 %v1336_v13, %v1319_v5  ;;  %v1324_v16 = vsub.f32 %v1318_v10, %v1322_v8 }
 0xc72   :  { %v1350_v23 = vmul.f32 %v1349_v7, %v1347_v14  ;;  %v1326_v24 = vadd.f32 1e-05, %v1324_v16 }
 0xc74   :  { %1902 = vrsqrt.f32 %v1326_v24  ;;  %v1353_v21 = vadd.f32 %v1352_v17, %v1350_v23  ;;  %vm1343_vm9 = vweird.f32 %v1326_v24  ;;  %v1485_v23 = vperm.slane %v2478_v39, 4 }
 0xc76   :  { %1726 = vmatmul.msk.f32.vlgmr.msra.gmra.mxu3 %vm103_vm2, %v1353_v21 }
 0xc7a   :  { %v1903_v22 = vpop.eup %1902 }
 0xc7b   :  { %v1338_v26 = vmul.f32 %v1903_v22, %v1326_v24  ;;  %vm1344_vm8 = vweird.f32 %v1903_v22 }
 0xc7c   :  { %vm1345_vm10 = vmor %vm1343_vm9, %vm1344_vm8 }
 0xc7d   :  { %v1339_v27 = vmul.f32 %v1903_v22, %v1338_v26 }
 0xc7f   :  { %v1340_v28 = vmul.f32 0.5, %v1339_v27 }
 0xc81   :  { %v1341_v29 = vsub.f32 1.5, %v1340_v28 }
 0xc83   :  { %v1342_v30 = vmul.f32 %v1903_v22, %v1341_v29 }
 0xc85   :  { %v1346_v32 = vsel %vm1345_vm10, %v1903_v22, %v1342_v30  ;;  %v1488_v22 = vperm.slane %v2478_v39, 5 }
 0xc86   :  { %v1348_v33 = vmul.f32 %v1346_v32, %v1320_v31 }
 0xc88   :  { %v1351_v34 = vmul.f32 %v1349_v7, %v1348_v33 }
 0xc8a   :  { %v1354_v35 = vadd.f32 %v1352_v17, %v1351_v34 }
 0xc8c   :  { %1727 = vmatmul.msk.f32.gmra.mxu3 %vm103_vm2, %v1354_v35 }
 0xcf9   :  { %v1388_v42 = vpop.f32.mrf.mxu3 }
 0xcfa   :  { %v1389_v43 = vadd.f32 %v1824_v41, %v1388_v42 }
 0xcfc   :  { %v1394_v6 = vmax.f32 %v1389_v43, 0.0 }
 0xcfe   :  { %1736 = vmatmul.msk.f32.vlgmr.msra.gmra.mxu0 %vm709_vm13, %v1394_v6 }
 0xd0f   :  { %v1391_v15 = vpop.f32.mrf.mxu3 }
 0xd10   :  { %v1392_v44 = vadd.f32 %v1824_v41, %v1391_v15 }
 0xd12   :  { %v1395_v45 = vmax.f32 %v1392_v44, 0.0 }
 0xd14   :  { %1737 = vmatmul.msk.f32.gmra.mxu0 %vm709_vm13, %v1395_v45 }
 0xd7b   :  { %v1429_v48 = vpop.f32.mrf.mxu0 }
 0xd7c   :  { %v1430_v49 = vadd.f32 %v1429_v48, %v1405_v46 }
 0xd7e   :  { %v1435_v50 = vadd.f32 %v1430_v49, %v1353_v21 }
 0xd80   :  { %v1437_v56 = vsel %vm103_vm2, %v1435_v50, 0.0  ;;  %v1445_v58 = vmul.f32 %v1435_v50, %v1435_v50 }
 0xd81   :  { %1438 = vadd.xlane.f32.xlu2 %v1437_v56 }
 0xd82   :  { %v1447_v38 = vsel %vm103_vm2, %v1445_v58, 0.0  ;;  %v1581_v58 = vld [vmem:[%s2705_s12 + $0x70] sm:$0xff] }
 0xd91   :  { %v1432_v51 = vpop.f32.mrf.mxu0 }
 0xd92   :  { %v1433_v55 = vadd.f32 %v1432_v51, %v1405_v46  ;;  %v1598_v51 = vld [vmem:[%s2705_s12 + $0xf8] sm:$0xff] }
 0xd93   :  { %1623 = vmatpush.msra.mxu2 %v1598_v51 }
 0xd94   :  { %v1436_v52 = vadd.f32 %v1433_v55, %v1354_v35  ;;  %v1597_v55 = vld [vmem:[%s2705_s12 + $0xf0] sm:$0xff] }
 0xd95   :  { %1624 = vmatpush.msra.mxu2 %v1597_v55 }
 0xd96   :  { %v1440_v53 = vsel %vm103_vm2, %v1436_v52, 0.0  ;;  %v1446_v54 = vmul.f32 %v1436_v52, %v1436_v52 }
 0xd97   :  { %1441 = vadd.xlane.f32.xlu2 %v1440_v53  ;;  %v1595_v53 = vld [vmem:[%s2705_s12 + $0xe0] sm:$0xff] }
 0xd98   :  { %v1450_v57 = vsel %vm103_vm2, %v1446_v54, 0.0  ;;  %v1582_v54 = vld [vmem:[%s2705_s12 + $0x78] sm:$0xff] }
 0xd99   :  { %1451 = vadd.xlane.f32.xlu0 %v1450_v57  ;;  %v1594_v57 = vld [vmem:[%s2705_s12 + $0xd8] sm:$0xff]  ;;  %1603 = vmatpush.msra.mxu1 %v1582_v54 }
 0xd9b   :  { %1604 = vmatpush.msra.mxu1 %v1581_v58 }
 0xd9f   :  { %1448 = vadd.xlane.f32.xlu2 %v1447_v38  ;;  %v1593_v38 = vld [vmem:[%s2705_s12 + $0xd0] sm:$0xff] }
 0xdf4   :  { %v1439_v59 = vpop.xlane.xlu2 %1438 }
 0xdf5   :  { %v1443_v0 = vmul.f32 %v1439_v59, %v2232_v9  ;;  %v1580_v59 = vld [vmem:[%s2705_s12 + $0x68] sm:$0xff] }
 0xdf6   :  { %1605 = vmatpush.msra.mxu1 %v1580_v59 }
 0xdf7   :  { %v1457_v4 = vmul.f32 %v1443_v0, %v1443_v0  ;;  %v1455_v28 = vsub.f32 %v1435_v50, %v1443_v0  ;;  %v1577_v0 = vld [vmem:[%s2705_s12 + $0x50] sm:$0xff] }
 0xe0a   :  { %v1442_v47 = vpop.xlane.xlu2 %1441 }
 0xe0b   :  { %v1444_v60 = vmul.f32 %v1442_v47, %v2232_v9  ;;  %v1592_v47 = vld [vmem:[%s2705_s12 + $0xc8] sm:$0xff] }
 0xe0c   :  { %v1452_v61 = vpop.xlane.xlu0 %1451 }
 0xe0d   :  { %v1458_v62 = vmul.f32 %v1444_v60, %v1444_v60  ;;  %v1454_v63 = vmul.f32 %v1452_v61, %v2232_v9  ;;  %v1456_v19 = vsub.f32 %v1436_v52, %v1444_v60  ;;  %v1596_v52 = vld [vmem:[%s2705_s12 + $0xe8] sm:$0xff]  ;;  %v1579_v60 = vld [vmem:[%s2705_s12 + $0x60] sm:$0xff] }
 0xe0e   :  { %1625 = vmatpush.msra.mxu2 %v1596_v52  ;;  %v1591_v61 = vld [vmem:[%s2705_s12 + $0xc0] sm:$0xff]  ;;  %1606 = vmatpush.msra.mxu1 %v1579_v60 }
 0xe0f   :  { %v1460_v20 = vsub.f32 %v1454_v63, %v1458_v62  ;;  %v1578_v62 = vld [vmem:[%s2705_s12 + $0x58] sm:$0xff] }
 0xe10   :  { %1626 = vmatpush.msra.mxu2 %v1595_v53  ;;  %v1590_v63 = vld [vmem:[%s2705_s12 + $0xb8] sm:$0xff]  ;;  %1607 = vmatpush.msra.mxu1 %v1578_v62 }
 0xe11   :  { %v1462_v12 = vadd.f32 1e-05, %v1460_v20  ;;  %v1589_v20 = vld [vmem:[%s2705_s12 + $0xb0] sm:$0xff] }
 0xe12   :  { %v1449_v2 = vpop.xlane.xlu2 %1448  ;;  %1627 = vmatpush.msra.mxu2 %v1594_v57  ;;  %1608 = vmatpush.msra.mxu1 %v1577_v0 }
 0xe13   :  { %1904 = vrsqrt.f32 %v1462_v12  ;;  %v1453_v1 = vmul.f32 %v1449_v2, %v2232_v9  ;;  %vm1479_vm12 = vweird.f32 %v1462_v12  ;;  %v1588_v2 = vld [vmem:[%s2705_s12 + $0xa8] sm:$0xff] }
 0xe14   :  { %1628 = vmatpush.msra.mxu2 %v1593_v38 }
 0xe15   :  { %v1459_v18 = vsub.f32 %v1453_v1, %v1457_v4  ;;  %v1575_v4 = vld [vmem:[%s2705_s12 + $0x40] sm:$0xff] }
 0xe16   :  { %1629 = vmatpush.msra.mxu2 %v1592_v47  ;;  %v1587_v1 = vld [vmem:[%s2705_s12 + $0xa0] sm:$0xff] }
 0xe17   :  { %v1461_v3 = vadd.f32 1e-05, %v1459_v18  ;;  %v1574_v18 = vld [vmem:[%s2705_s12 + $0x38] sm:$0xff] }
 0xe18   :  { %1630 = vmatpush.msra.mxu2 %v1591_v61 }
 0xe19   :  { %v1905_v5 = vpop.eup %1904  ;;  %1906 = vrsqrt.f32 %v1461_v3  ;;  %vm1469_vm0 = vweird.f32 %v1461_v3 }
 0xe1a   :  { %v1474_v7 = vmul.f32 %v1905_v5, %v1462_v12  ;;  %vm1480_vm11 = vweird.f32 %v1905_v5  ;;  %1631 = vmatpush.msra.mxu2 %v1590_v63  ;;  %v1576_v12 = vld [vmem:[%s2705_s12 + $0x48] sm:$0xff] }
 0xe1b   :  { %vm1481_vm14 = vmor %vm1479_vm12, %vm1480_vm11  ;;  %1609 = vmatpush.msra.mxu1 %v1576_v12 }
 0xe1c   :  { %v1475_v8 = vmul.f32 %v1905_v5, %v1474_v7  ;;  %1632 = vmatpush.msra.mxu2 %v1589_v20  ;;  %v1585_v7 = vld [vmem:[%s2705_s12 + $0x90] sm:$0xff] }
 0xe1d   :  { %1610 = vmatpush.msra.mxu1 %v1575_v4 }
 0xe1e   :  { %v1476_v10 = vmul.f32 0.5, %v1475_v8  ;;  %1633 = vmatpush.msra.mxu2 %v1588_v2  ;;  %v1572_v8 = vld [vmem:[%s2705_s12 + $0x28] sm:$0xff] }
 0xe1f   :  { %v1907_v11 = vpop.eup %1906  ;;  %1611 = vmatpush.msra.mxu1 %v1574_v18 }
 0xe20   :  { %v1477_v13 = vsub.f32 1.5, %v1476_v10  ;;  %v1464_v14 = vmul.f32 %v1907_v11, %v1461_v3  ;;  %vm1470_vm15 = vweird.f32 %v1907_v11  ;;  %1634 = vmatpush.msra.mxu2 %v1587_v1  ;;  %v1586_v3 = vld [vmem:[%s2705_s12 + $0x98] sm:$0xff]  ;;  %v1584_v10 = vld [vmem:[%s2705_s12 + $0x88] sm:$0xff] }
 0xe21   :  { %vm1471_vm1 = vmor %vm1469_vm0, %vm1470_vm15 }
 0xe22   :  { %v1478_v16 = vmul.f32 %v1905_v5, %v1477_v13  ;;  %v1465_v17 = vmul.f32 %v1907_v11, %v1464_v14  ;;  %1635 = vmatpush.msra.mxu2 %v1586_v3  ;;  %v1583_v13 = vld [vmem:[%s2705_s12 + $0x80] sm:$0xff]  ;;  %v1570_v14 = vld [vmem:[%s2705_s12 + $0x18] sm:$0xff] }
 0xe24   :  { %v1482_v24 = vsel %vm1481_vm14, %v1905_v5, %v1478_v16  ;;  %v1466_v9 = vmul.f32 0.5, %v1465_v17  ;;  %v1573_v5 = vld [vmem:[%s2705_s12 + $0x30] sm:$0xff]  ;;  %1636 = vmatpush.msra.mxu2 %v1585_v7  ;;  %v1568_v17 = vld [vmem:[%s2705_s12 + $0x8] sm:$0xff] }
 0xe25   :  { %v1484_v25 = vmul.f32 %v1482_v24, %v1456_v19  ;;  %1612 = vmatpush.msra.mxu1 %v1573_v5  ;;  %v1569_v16 = vld [vmem:[%s2705_s12 + $0x10] sm:$0xff]  ;;  %v1567_v19 = vld [vmem:[%s2705_s12] sm:$0xff] }
 0xe26   :  { %v1467_v21 = vsub.f32 1.5, %v1466_v9  ;;  %1637 = vmatpush.msra.mxu2 %v1584_v10 }
 0xe27   :  { %v1487_v26 = vmul.f32 %v1485_v23, %v1484_v25  ;;  %1613 = vmatpush.msra.mxu1 %v1572_v8 }
 0xe28   :  { %v1468_v27 = vmul.f32 %v1907_v11, %v1467_v21  ;;  %1638 = vmatpush.msra.mxu2 %v1583_v13 }
 0xe29   :  { %v2553_v31 = vadd.f32 %v1488_v22, %v1487_v26 }
 0xe2a   :  { %v1472_v29 = vsel %vm1471_vm1, %v1907_v11, %v1468_v27  ;;  %v1571_v11 = vld [vmem:[%s2705_s12 + $0x20] sm:$0xff] }
 0xe2b   :  { %v1483_v30 = vmul.f32 %v1472_v29, %v1455_v28  ;;  %v1548_v34 = vrot.slane %v2553_v31, 7  ;;  %v1544_v35 = vrot.slane %v2553_v31, 6  ;;  %v1540_v40 = vrot.slane %v2553_v31, 5  ;;  %1614 = vmatpush.msra.mxu1 %v1571_v11 }
 0xe2c   :  { %v1534_v45 = vrot.slane %v2553_v31, 3  ;;  %v1526_v46 = vrot.slane %v2553_v31, 1  ;;  %v1530_v48 = vrot.slane %v2553_v31, 2 }
 0xe2d   :  { %v1486_v32 = vmul.f32 %v1485_v23, %v1483_v30  ;;  %1615 = vmatpush.msra.mxu1 %v1570_v14 }
 0xe2f   :  { %v2555_v33 = vadd.f32 %v1488_v22, %v1486_v32  ;;  %1616 = vmatpush.msra.mxu1 %v1569_v16  ;;  %v1538_v22 = vrot.slane %v2553_v31, 4 }
 0xe31   :  { %v1514_v36 = vrot.slane %v2555_v33, 7  ;;  %v1510_v39 = vrot.slane %v2555_v33, 6  ;;  %v1506_v37 = vrot.slane %v2555_v33, 5  ;;  %v1500_v6 = vrot.slane %v2555_v33, 3  ;;  %1617 = vmatpush.msra.mxu1 %v1568_v17 }
 0xe32   :  { %v1492_v15 = vrot.slane %v2555_v33, 1  ;;  %v1496_v44 = vrot.slane %v2555_v33, 2  ;;  %v1504_v28 = vrot.slane %v2555_v33, 4 }
 0xe33   :  { %v1800_v41 = vpack.i.bf16 %v1514_v36, %v1548_v34  ;;  %v1795_v42 = vpack.i.bf16 %v1510_v39, %v1544_v35  ;;  %v1790_v43 = vpack.i.bf16 %v1506_v37, %v1540_v40  ;;  %v1815_v49 = vpack.i.bf16 %v1500_v6, %v1534_v45  ;;  %1618 = vmatpush.msra.mxu1 %v1567_v19 }
 0xe34   :  { %v1805_v50 = vpack.i.bf16 %v1492_v15, %v1526_v46  ;;  %v1810_v56 = vpack.i.bf16 %v1496_v44, %v1530_v48 }
 0xe35   :  { %1801 = vrot.lane.b32.xlu2 %v1800_v41, %s1911_s18  ;;  %1796 = vrot.lane.b32.xlu0 %v1795_v42, %s1912_s2 }
 0xe36   :  { %1791 = vrot.lane.b32.xlu1 %v1790_v43, %s1917_s10 }
 0xe3d   :  { %1816 = vrot.lane.b32.xlu2 %v1815_v49, %s1911_s18  ;;  %1806 = vrot.lane.b32.xlu0 %v1805_v50, %s1917_s10 }
 0xe3e   :  { %1811 = vrot.lane.b32.xlu1 %v1810_v56, %s1912_s2 }
 0xe8f   :  { %v1802_v23 = vpop.permute.xlu2 %1801 }
 0xe90   :  { %v1803_v29 = vunpack.i.l.bf16 %v1802_v23  ;;  %v1804_v36 = vunpack.i.h.bf16 %v1802_v23 }
 0xe97   :  { %v1817_v40 = vpop.permute.xlu2 %1816 }
 0xe98   :  { %v1818_v48 = vunpack.i.l.bf16 %v1817_v40  ;;  %v1819_v55 = vunpack.i.h.bf16 %v1817_v40 }
 0xea7   :  { %v1797_v24 = vpop.permute.xlu0 %1796 }
 0xea8   :  { %v1799_v9 = vunpack.i.h.bf16 %v1797_v24  ;;  %v1798_v25 = vunpack.i.l.bf16 %v1797_v24  ;;  %v1792_v21 = vpop.permute.xlu1 %1791 }
 0xea9   :  { %v1794_v26 = vunpack.i.h.bf16 %v1792_v21  ;;  %v1793_v27 = vunpack.i.l.bf16 %v1792_v21 }
 0xeab   :  { %v1522_v30 = vsel %vm103_vm2, %v1504_v28, %v1794_v26  ;;  %v1555_v32 = vsel %vm103_vm2, %v1538_v22, %v1793_v27 }
 0xeac   :  { %v1556_v34 = vsel %vm709_vm13, %v1555_v32, %v1798_v25  ;;  %v1523_v35 = vsel %vm709_vm13, %v1522_v30, %v1799_v9 }
 0xead   :  { %v1557_v39 = vsel %vm1520_vm6, %v1556_v34, %v1803_v29  ;;  %v1524_v42 = vsel %vm1520_vm6, %v1523_v35, %v1804_v36 }
 0xeae   :  { %v1561_v37 = vrot.slane %v1557_v39, 7 }
 0xeaf   :  { %v1807_v41 = vpop.permute.xlu0 %1806 }
 0xeb0   :  { %v1812_v43 = vpop.permute.xlu1 %1811  ;;  %v1809_v6 = vunpack.i.h.bf16 %v1807_v41  ;;  %v1808_v15 = vunpack.i.l.bf16 %v1807_v41  ;;  %v1566_v44 = vsel %vm1564_vm7, %v1524_v42, %v1561_v37 }
 0xeb1   :  { %v1814_v45 = vunpack.i.h.bf16 %v1812_v43  ;;  %v1813_v46 = vunpack.i.l.bf16 %v1812_v43  ;;  %1639 = vmatmul.f32.vlgmr.msra.gmra.mxu2 %v1566_v44 }
 0xeb2   :  { %v1518_v49 = vsel %vm103_vm2, %v2555_v33, %v1809_v6  ;;  %v1552_v50 = vsel %vm103_vm2, %v2553_v31, %v1808_v15  ;;  %v1825_v33 = vld [vmem:[%s2706_s13] ss:$0 sm:$0xff] }
 0xeb3   :  { %v1519_v56 = vsel %vm709_vm13, %v1518_v49, %v1814_v45  ;;  %v1553_v51 = vsel %vm709_vm13, %v1552_v50, %v1813_v46 }
 0xeb4   :  { %v1554_v52 = vsel %vm1520_vm6, %v1553_v51, %v1818_v48  ;;  %v1521_v54 = vsel %vm1520_vm6, %v1519_v56, %v1819_v55 }
 0xeb5   :  { %v1560_v53 = vrot.slane %v1554_v52, 7 }
 0xeb7   :  { %v1565_v57 = vsel %vm1564_vm7, %v1521_v54, %v1560_v53 }
 0xeb8   :  { %1619 = vmatmul.f32.vlgmr.msra.gmra.mxu1 %v1565_v57 }
 0xf34   :  { %v1640_v31 = vpop.f32.mrf.mxu2 }
 0xf35   :  { %v1620_v58 = vpop.f32.mrf.mxu1 }
 0xf36   :  { %v1621_v38 = vadd.f32 %v1825_v33, %v1620_v58 }
 0xf38   :  { %v1641_v59 = vadd.f32 %v1640_v31, %v1621_v38 }
 0xf3a   :  { %1643 = vst [vmem:[%s2707_s14] sm:$0x3] %v1641_v59 }

</bundles_post_ra>
